<compile_context>
chip_gen: v6e
topology: v6e:2x2x1
jax: 0.10.0
libtpu: 0.0.40
codegen_flags: <defaults>
</compile_context>

<pallas_src>
import functools

import jax
import jax.numpy as jnp
from jax.experimental import pallas as pl
from jax.experimental.pallas import tpu as pltpu


def _cdiv(a, b):
    return -(-a // b)


def _round_up(x, m):
    return _cdiv(x, m) * m


def _score_tile(h, e2t, a, b, o_ref):
    """Shared epilogue: o = sigmoid(-sqrt(||h||^2 + ||e2||^2 - 2 h.e2))."""
    # MXU: (TM, D) @ (D, TN) -> (TM, TN), f32 accumulator.
    ab = jnp.dot(h, e2t, preferred_element_type=jnp.float32)
    s = a + b - 2.0 * ab
    s = jnp.maximum(s, 0.0)           # guard against f32/bf16 cancellation
    d = jnp.sqrt(s)                   # EUP
    e = jnp.exp(-d)                   # EUP, e in (0, 1] -> never overflows
    out = e * pl.reciprocal(1.0 + e, approx=True)   # sigmoid(-d); EUP recip
    o_ref[...] = out.astype(o_ref.dtype)


def _streamed_kernel(h_ref, e2t_ref, a_ref, b_ref, o_ref):
    _score_tile(h_ref[...], e2t_ref[...], a_ref[...], b_ref[...], o_ref)


def _resident_kernel(h_ref, e2t_ref, a_ref, b_ref, o_ref, *, tn):
    # E2^T is fully VMEM-resident (DMA'd once); slice this step's column block.
    col0 = pl.multiple_of(pl.program_id(1) * tn, 128)
    _score_tile(h_ref[...], e2t_ref[:, pl.ds(col0, tn)],
                a_ref[...], b_ref[...], o_ref)


def transe_forward(E1, R, E2, *, tm=512, tn=512,
                   matmul_dtype=jnp.bfloat16, out_dtype=jnp.float32,
                   e2t_resident=None, vmem_limit_bytes=64 * 1024 * 1024):
    """Pairwise TransE scores: sigmoid(-||(E1+R)_i - E2_j||)  ->  [N1, N2]."""
    N1, D = E1.shape
    N2, D2 = E2.shape
    assert D == D2, "embedding dims of E1/R and E2 must match"

    # ---- wrapper precompute (tiny mem-bound ops, reused by every tile) ------
    Hf = E1.astype(jnp.float32) + R.astype(jnp.float32)          # [N1, D] f32
    E2f = E2.astype(jnp.float32)
    a = jnp.sum(Hf * Hf, axis=1, keepdims=True)                  # [N1, 1] f32
    b = jnp.sum(E2f * E2f, axis=1, keepdims=True).T              # [1, N2] f32
    H = Hf.astype(matmul_dtype)                                  # [N1, D] bf16
    E2T = E2f.T.astype(matmul_dtype)                             # [D, N2] bf16

    mm_bytes = jnp.dtype(matmul_dtype).itemsize
    out_bytes = jnp.dtype(out_dtype).itemsize

    # ---- tile selection -----------------------------------------------------
    # Lane-dense output tiles: TM % 8 == 0, TN % 128 == 0. Never shrink below
    # alignment for small problems -- pad the problem up instead.
    tm = _round_up(max(8, min(tm, _round_up(N1, 8))), 8)
    tn = _round_up(max(128, min(tn, _round_up(N2, 128))), 128)

    budget = int(0.75 * vmem_limit_bytes)     # pipelining / spill headroom

    def _streamed_fp(tm_, tn_):
        # H double-buffered + E2T triple-buffered + out double-buffered + a/b.
        return ((2 * tm_ + 3 * tn_) * D * mm_bytes
                + 2 * tm_ * tn_ * out_bytes + 2 * (tm_ + tn_) * 4)

    while _streamed_fp(tm, tn) > budget and (tm > 8 or tn > 128):
        if tn >= tm and tn > 128:
            tn = max(128, _round_up(tn // 2, 128))
        elif tm > 8:
            tm = max(8, _round_up(tm // 2, 8))
        else:
            tn = max(128, _round_up(tn // 2, 128))

    N1p = _round_up(N1, tm)
    N2p = _round_up(N2, tn)

    # v7x has 2 TensorCores: make sure small problems still expose >= 2 blocks.
    if (N1p // tm) * (N2p // tn) < 2:
        if N1p // 8 >= 2:
            tm = _round_up(_cdiv(N1p, 2), 8)
            N1p = _round_up(N1, tm)
        elif N2p // 128 >= 2:
            tn = _round_up(_cdiv(N2p, 2), 128)
            N2p = _round_up(N2, tn)

    # ---- E2^T residency decision --------------------------------------------
    def _resident_fp(tm_, tn_):
        return ((2 * tm_ + 2 * N2p) * D * mm_bytes
                + 2 * tm_ * tn_ * out_bytes + 2 * (tm_ + tn_) * 4)

    if e2t_resident is None:
        resident = _resident_fp(tm, tn) <= budget
    else:
        resident = bool(e2t_resident)

    # ---- padding (padded rows/cols are zeros; sliced off at the end) --------
    if N1p != N1:
        H = jnp.pad(H, ((0, N1p - N1), (0, 0)))
        a = jnp.pad(a, ((0, N1p - N1), (0, 0)))
    if N2p != N2:
        E2T = jnp.pad(E2T, ((0, 0), (0, N2p - N2)))
        b = jnp.pad(b, ((0, 0), (0, N2p - N2)))

    if resident:
        # Constant block index -> Pallas DMAs E2^T into VMEM exactly once.
        e2t_spec = pl.BlockSpec((D, N2p), lambda i, j: (0, 0))
        kernel = functools.partial(_resident_kernel, tn=tn)
    else:
        # Streamed column tiles; deeper buffering hides HBM latency on the one
        # operand that changes every inner grid step.  Fall back cleanly if
        # this Pallas build does not accept the pipeline_mode kwarg.
        try:
            e2t_spec = pl.BlockSpec((D, tn), lambda i, j: (0, j),
                                    pipeline_mode=pl.Buffered(3))
        except TypeError:
            e2t_spec = pl.BlockSpec((D, tn), lambda i, j: (0, j))
        kernel = _streamed_kernel

    grid = (N1p // tm, N2p // tn)

    cost = pl.CostEstimate(
        flops=2 * N1p * N2p * D,
        transcendentals=3 * N1p * N2p,             # sqrt + exp + reciprocal
        bytes_accessed=((N1p * D + D * N2p) * mm_bytes
                        + (N1p + N2p) * 4
                        + N1p * N2p * out_bytes))

    out = pl.pallas_call(
        kernel,
        out_shape=jax.ShapeDtypeStruct((N1p, N2p), out_dtype),
        grid=grid,
        in_specs=[
            pl.BlockSpec((tm, D), lambda i, j: (i, 0)),   # H tile (full D)
            e2t_spec,                                     # E2^T (resident/streamed)
            pl.BlockSpec((tm, 1), lambda i, j: (i, 0)),   # ||H_i||^2
            pl.BlockSpec((1, tn), lambda i, j: (0, j)),   # ||E2_j||^2
        ],
        out_specs=pl.BlockSpec((tm, tn), lambda i, j: (i, j)),
        compiler_params=pltpu.CompilerParams(
            dimension_semantics=("parallel", "parallel"),
            vmem_limit_bytes=int(vmem_limit_bytes)),
        cost_estimate=cost,
    )(H, E2T, a, b)

    return out[:N1, :N2]


def _transe_ref(E1, R, E2):
    H = E1 + R
    A = jnp.sum(H * H, axis=1, keepdims=True)
    B = jnp.sum(E2 * E2, axis=1, keepdims=True).T
    S = A + B - 2.0 * (H @ E2.T)
    return jax.nn.sigmoid(-jnp.sqrt(jnp.maximum(S, 0.0)))


if __name__ == "__main__":
    key = jax.random.PRNGKey(0)
    k1, k2, k3 = jax.random.split(key, 3)

    N1, N2, D = 256, 512, 64            # small demo shapes
    E1 = jax.random.normal(k1, (N1, D), dtype=jnp.float32)
    R = jax.random.normal(k2, (N1, D), dtype=jnp.float32)
    E2 = jax.random.normal(k3, (N2, D), dtype=jnp.float32)

    ref = jax.block_until_ready(_transe_ref(E1, R, E2))

    # Default path: bf16 matmul operands, E2^T VMEM-resident (auto-selected).
    out_res = jax.block_until_ready(transe_forward(E1, R, E2))
    assert out_res.shape == (N1, N2)
    assert jnp.allclose(out_res, ref, atol=2e-3, rtol=2e-3), "resident path mismatch"

    # Streamed-E2^T path (forced) to exercise the Buffered(3) pipeline branch.
    out_str = jax.block_until_ready(transe_forward(E1, R, E2, e2t_resident=False))
    assert jnp.allclose(out_str, ref, atol=2e-3, rtol=2e-3), "streamed path mismatch"

    # Optional bf16 output (halves the dominant HBM stream) with looser tol.
    out_bf16 = jax.block_until_ready(transe_forward(E1, R, E2, out_dtype=jnp.bfloat16))
    assert jnp.allclose(out_bf16.astype(jnp.float32), ref, atol=8e-3, rtol=8e-3), \
        "bf16-output path mismatch"

    print("KERNEL_OK")
</pallas_src>

<mosaic_0001>
module attributes {stable_mosaic.version = 11 : i64} {
  func.func @_resident_kernel(%arg0: i32, %arg1: i32, %arg2: memref<128x64xbf16, #tpu.memory_space<vmem>>, %arg3: memref<64x512xbf16, #tpu.memory_space<vmem>>, %arg4: memref<128x1xf32, #tpu.memory_space<vmem>>, %arg5: memref<1x512xf32, #tpu.memory_space<vmem>>, %arg6: memref<128x512xf32, #tpu.memory_space<vmem>>) attributes {dimension_semantics = [#tpu.dimension_semantics<parallel>, #tpu.dimension_semantics<parallel>], iteration_bounds = array<i64: 2, 1>, scalar_prefetch = 0 : i64, scratch_operands = 0 : i64, tpu.core_type = #tpu.core_type<tc>, window_params = [{transform_indices = @transform_0, window_bounds = array<i64: 128, 64>}, {pipeline_mode = #tpu.pipeline_mode<synchronous>, transform_indices = @transform_1, window_bounds = array<i64: 64, 512>}, {transform_indices = @transform_2, window_bounds = array<i64: 128, 1>}, {transform_indices = @transform_3, window_bounds = array<i64: 1, 512>}, {transform_indices = @transform_4, window_bounds = array<i64: 128, 512>}]} {
    %c512_i32 = arith.constant 512 : i32
    %0 = arith.muli %arg1, %c512_i32 : i32
    %1 = tpu.assume_multiple %0, 128 : i32
    %c0 = arith.constant 0 : index
    %c0_0 = arith.constant 0 : index
    %2 = vector.load %arg2[%c0, %c0_0] : memref<128x64xbf16, #tpu.memory_space<vmem>>, vector<128x64xbf16>
    %c0_1 = arith.constant 0 : index
    %3 = arith.index_cast %1 : i32 to index
    %4 = vector.load %arg3[%c0_1, %3] : memref<64x512xbf16, #tpu.memory_space<vmem>>, vector<64x512xbf16>
    %c0_2 = arith.constant 0 : index
    %c0_3 = arith.constant 0 : index
    %5 = vector.load %arg4[%c0_2, %c0_3] : memref<128x1xf32, #tpu.memory_space<vmem>>, vector<128x1xf32>
    %c0_4 = arith.constant 0 : index
    %c0_5 = arith.constant 0 : index
    %6 = vector.load %arg5[%c0_4, %c0_5] : memref<1x512xf32, #tpu.memory_space<vmem>>, vector<1x512xf32>
    %cst = arith.constant dense<0.000000e+00> : vector<128x512xf32>
    %7 = tpu.matmul %2, %4, %cst {dimension_numbers = #tpu.dot_dimension_numbers<[1], [0], [0], [1], [0, 0, 1, 1], [], []>} : vector<128x64xbf16>, vector<64x512xbf16>, vector<128x512xf32> -> vector<128x512xf32>
    %8 = vector.broadcast %5 : vector<128x1xf32> to vector<128x512xf32>
    %9 = vector.broadcast %6 : vector<1x512xf32> to vector<128x512xf32>
    %10 = arith.addf %8, %9 : vector<128x512xf32>
    %cst_6 = arith.constant 2.000000e+00 : f32
    %11 = vector.broadcast %cst_6 : f32 to vector<128x512xf32>
    %12 = arith.mulf %11, %7 : vector<128x512xf32>
    %13 = arith.subf %10, %12 : vector<128x512xf32>
    %cst_7 = arith.constant 0.000000e+00 : f32
    %14 = vector.broadcast %cst_7 : f32 to vector<128x512xf32>
    %15 = arith.maximumf %13, %14 : vector<128x512xf32>
    %16 = math.sqrt %15 : vector<128x512xf32>
    %cst_8 = arith.constant 0.000000e+00 : f32
    %17 = vector.broadcast %cst_8 : f32 to vector<128x512xf32>
    %18 = arith.subf %17, %16 : vector<128x512xf32>
    %19 = math.exp %18 : vector<128x512xf32>
    %cst_9 = arith.constant 1.000000e+00 : f32
    %20 = vector.broadcast %cst_9 : f32 to vector<128x512xf32>
    %21 = arith.addf %20, %19 : vector<128x512xf32>
    %22 = tpu.reciprocal %21 {approx = true} : vector<128x512xf32> -> vector<128x512xf32>
    %23 = arith.mulf %19, %22 : vector<128x512xf32>
    %c0_10 = arith.constant 0 : index
    %c0_11 = arith.constant 0 : index
    %24 = vector.load %arg6[%c0_10, %c0_11] : memref<128x512xf32, #tpu.memory_space<vmem>>, vector<128x512xf32>
    tpu.vector_store %arg6[%c0_10, %c0_11], %23 {strides = array<i32>} : memref<128x512xf32, #tpu.memory_space<vmem>>, vector<128x512xf32>,
    return
  }
  func.func @transform_0(%arg0: i32, %arg1: i32) -> (i32, i32) {
    %c0_i32 = arith.constant 0 : i32
    %c0_i32_0 = arith.constant 0 : i32
    return %arg0, %c0_i32 : i32, i32
  }
  func.func @transform_1(%arg0: i32, %arg1: i32) -> (i32, i32) {
    %c0_i32 = arith.constant 0 : i32
    %c0_i32_0 = arith.constant 0 : i32
    %c0_i32_1 = arith.constant 0 : i32
    return %c0_i32, %c0_i32_0 : i32, i32
  }
  func.func @transform_2(%arg0: i32, %arg1: i32) -> (i32, i32) {
    %c0_i32 = arith.constant 0 : i32
    %c0_i32_0 = arith.constant 0 : i32
    return %arg0, %c0_i32 : i32, i32
  }
  func.func @transform_3(%arg0: i32, %arg1: i32) -> (i32, i32) {
    %c0_i32 = arith.constant 0 : i32
    %c0_i32_0 = arith.constant 0 : i32
    return %c0_i32, %arg1 : i32, i32
  }
  func.func @transform_4(%arg0: i32, %arg1: i32) -> (i32, i32) {
    %c0_i32 = arith.constant 0 : i32
    return %arg0, %arg1 : i32, i32
  }
}

</mosaic_0001>

<bundles_post_ra>
// kernel: tpu_custom_call.1
= control target key start
LH: loop header
LB: loop body
LE: loop exit
PB: predicated region body
PF: predicated region fallthrough
CT: control target
= control target key end

     0   :  { %9 = vsyncpa [#allocation3], 0  ;;  %s4207_s0 = inlined_call_operand.vmem [shape: bf16[256,64], index: 0, kind: input, shape index: {}]   ;;  %s4208_s1 = inlined_call_operand.vmem [shape: bf16[64,512], index: 1, kind: input, shape index: {}]   ;;  %s4209_s2 = inlined_call_operand.vmem [shape: f32[256,1], index: 2, kind: input, shape index: {}]   ;;  %s4210_s3 = inlined_call_operand.vmem [shape: f32[1,512], index: 3, kind: input, shape index: {}]   ;;  %s4211_s4 = inlined_call_operand.hbm [shape: f32[256,512], index: 4, kind: output, shape index: {}]  }
   0x1   :  { %11 = vsyncpa [#allocation3 + $0x1], 0  ;;  %s2692_s15 = smov 0   ;;  %s2694_s16 = smov 0  }
   0x2   :  { %s2696_s17 = smov 0   ;;  %s2698_s18 = smov 0  }
   0x3   :  { %s2700_s19 = smov 0   ;;  %s2702_s20 = smov 0  }
   0x4 LB: > { %s2050_s21 = sadd.s32 4294967295, %s2661_s20   ;;  %s2051_s22 = sadd.s32 4294967294, %s2661_s20   ;;  %s2661_s20 = sphi %s2702_s20, %s17_s20   ;;  %s2657_s19 = sphi %s2700_s19, %s4229_s19   ;;  %s2653_s18 = sphi %s2698_s18, %s4228_s18   ;;  %s2649_s17 = sphi %s2696_s17, %s4227_s17   ;;  %s2645_s16 = sphi %s2694_s16, %s4226_s16   ;;  %s2641_s15 = sphi %s2692_s15, %s4225_s15  }
   0x5   : > { %s29_s23 = sadd.s32 1, %s2657_s19  ;;  %s137_s24 = sadd.s32 1, %s2649_s17 }
   0x6   : > { %p31_p0 = scmp.ge.s32.totalorder %s29_s23, 2  ;;  %p147_p1 = scmp.ne.s32.totalorder %s2649_s17, %s2645_s16 }
   0x7   : > { %p148_p2 = scmp.eq.s32.totalorder %s2050_s21, 1  ;;  %p153_p3 = scmp.ne.s32.totalorder %s2645_s16, %s2641_s15 }
   0x8   : > { %s4231_s23 = smov (%p31_p0, %s29_s23), 0  ;;  %p154_p5 = scmp.eq.s32.totalorder %s2051_s22, 1 }
   0x9   : > { %p2732_p4 = por %p148_p2, %p147_p1  ;;  %s132_s26 = ssub.s32 %s2657_s19, %s4231_s23 }
   0xa   : > { %p2055_p6 = scmp.ge.s32.totalorder %s2661_s20, 1  ;;  %p135_p7 = scmp.eq.s32.totalorder %s132_s26, 0 }
   0xb   : > { %p2739_p8 = por %p154_p5, %p153_p3  ;;  %p201_p9 = scmp.lt.s32.totalorder %s2661_s20, 3 }
   0xc   : > { %s2745_s28 = scalar_select %p135_p7, %s2649_s17, %s137_s24  }
   0xd   : > { %p202_p10 = pnand %p2055_p6, %p201_p9 }
   0xf   : > { %205 = sbr.rel (%p202_p10) target bundleno = 549 (0x225), region = 36 }
  0x14   : > { %v2169_v0 = vld [vmem:[%s4208_s1 + $0x64] ss:$16 sps:$4 sm:$0xff]   ;;  %s2057_s5 = sshll.u32 %s2653_s18, 4  ;;  %v2171_v1 = vld [vmem:[%s4208_s1 + $0x6c] ss:$16 sps:$4 sm:$0xff]   ;;  %v2663_v2 = vmov 0   ;;  %v762_v44 = vlaneseq }
  0x15   : > { %487 = vmatprep.mubr.bf16.mxu0 %v2663_v2  ;;  %600 = vmatprep.mubr.bf16.mxu1 %v2663_v2  ;;  %p237_p11 = scmp.lt.s32.totalorder %s2057_s5, 31  ;;  %v2173_v3 = vld [vmem:[%s4208_s1 + $0x60] ss:$16 sps:$4 sm:$0xff]   ;;  %v2174_v4 = vld [vmem:[%s4208_s1 + $0x68] ss:$16 sps:$4 sm:$0xff]   ;;  %vm430_vm0 = vcmask 523264  }
  0x16   : > { %463 = vmatprep.subr.bf16.mxu0 %v2169_v0  ;;  %2167 = vset.pattern.permute.xlu0 %v2663_v2  ;;  %v2175_v5 = vld [vmem:[%s4208_s1 + $0x44] ss:$16 sps:$4 sm:$0xff]   ;;  %v2177_v6 = vld [vmem:[%s4208_s1 + $0x4c] ss:$16 sps:$4 sm:$0xff]   ;;  %v2179_v7 = vld [vmem:[%s4208_s1 + $0x40] ss:$16 sps:$4 sm:$0xff]  }
  0x17   : > { %576 = vmatprep.subr.bf16.mxu1 %v2171_v1  ;;  %s4233_s5 = smov (!%p237_p11, %s2057_s5), 31  ;;  %2168 = vset.pattern.permute.xlu1 %v2663_v2  ;;  %v2180_v8 = vld [vmem:[%s4208_s1 + $0x48] ss:$16 sps:$4 sm:$0xff]   ;;  %v2181_v9 = vld [vmem:[%s4208_s1 + $0x24] ss:$16 sps:$4 sm:$0xff]   ;;  %v763_v45 = vshrl.u32 %v762_v44, 7 }
  0x18   : > { %464 = vmatpush1.bf16.msra.mxu0 %v2173_v3  ;;  %577 = vmatpush1.bf16.msra.mxu1 %v2174_v4  ;;  %s2058_s7 = sshll.u32 %s4233_s5, 2  ;;  %v2183_v10 = vld [vmem:[%s4208_s1 + $0x2c] ss:$16 sps:$4 sm:$0xff]   ;;  %v2185_v11 = vld [vmem:[%s4208_s1 + $0x20] ss:$16 sps:$4 sm:$0xff]   ;;  %s2060_s6 = sshll.u32 %s4233_s5, 3 }
  0x19   : > { %465 = vmatprep.subr.bf16.mxu0 %v2175_v5  ;;  %578 = vmatprep.subr.bf16.mxu1 %v2177_v6  ;;  %v2186_v12 = vld [vmem:[%s4208_s1 + $0x28] ss:$16 sps:$4 sm:$0xff]   ;;  %v2187_v13 = vld [vmem:[%s4208_s1 + $0x4] ss:$16 sps:$4 sm:$0xff]   ;;  %v2189_v14 = vld [vmem:[%s4208_s1 + $0xc] ss:$16 sps:$4 sm:$0xff]   ;;  %s2800_s30 = scalar_lea.vmem %s4207_s0, %s2058_s7  ;;  %s2813_s7 = scalar_lea.vmem %s4209_s2, %s2060_s6 }
  0x1a   : > { %v2191_v15 = vld [vmem:[%s4208_s1] ss:$16 sps:$4 sm:$0xff]   ;;  %v2192_v16 = vld [vmem:[%s4208_s1 + $0x8] ss:$16 sps:$4 sm:$0xff]   ;;  %v764_v48 = vsub.s32 0, %v763_v45  ;;  %v772_v50 = vsub.s32 2, %v763_v45 }
  0x1b   : > { %v2193_v17 = vld [vmem:[%s2800_s30] sm:$0xff]   ;;  %v295_v19 = vld [vmem:[%s2813_s7 + $0x10] sm:$0xff]  ;;  %v294_v20 = vld [vmem:[%s2813_s7 + $0x8] sm:$0xff]  ;;  %v768_v51 = vsub.s32 1, %v763_v45  ;;  %v776_v52 = vsub.s32 3, %v763_v45  ;;  %s233_s21 = sand.u32 1, %s2645_s16  }
  0x1c   : > { %466 = vmatpush1.bf16.msra.mxu0 %v2179_v7  ;;  %579 = vmatpush1.bf16.msra.mxu1 %v2180_v8  ;;  %v293_v18 = vld [vmem:[%s2813_s7] sm:$0xff]  ;;  %v296_v21 = vld [vmem:[%s2813_s7 + $0x18] sm:$0xff]  ;;  %v2194_v22 = vld [vmem:[%s2800_s30 + $0x8] sm:$0xff]   ;;  %s3235_s22 = sshll.u32 %s233_s21, 9  ;;  %s2108_s26 = sshll.u32 %s2653_s18, 13 }
  0x1d   : > { %467 = vmatprep.subr.bf16.mxu0 %v2181_v9  ;;  %580 = vmatprep.subr.bf16.mxu1 %v2183_v10  ;;  %v298_v23 = vld [vmem:[%s2813_s7 + $0x28] sm:$0xff]  ;;  %v297_v24 = vld [vmem:[%s2813_s7 + $0x20] sm:$0xff]  ;;  %v300_v25 = vld [vmem:[%s2813_s7 + $0x38] sm:$0xff]  ;;  %s3266_s24 = scalar_lea.vmem [#allocation2], %s3235_s22  ;;  %s4155_s8 = scalar_lea.hbm %s4211_s4, %s2108_s26 }
  0x1e   : > { %683 = vperm.xlu0 %2167, %v293_v18   ;;  %693 = vperm.xlu1 %2168, %v295_v19   ;;  %v299_v26 = vld [vmem:[%s2813_s7 + $0x30] sm:$0xff]  ;;  %v302_v28 = vld [vmem:[%s2813_s7 + $0x48] sm:$0xff]  ;;  %v301_v29 = vld [vmem:[%s2813_s7 + $0x40] sm:$0xff]  ;;  %s1951_s29 = sshll.u32 %s3266_s24, 4  ;;  %s4162_s9 = scalar_lea.sflag [#allocation3], %s233_s21  ;;  %s4157_s29 = int_to_ptr.vmem [resolvable:$true] %s1951_s29 }
  0x1f   : > { %v2195_v27 = vld [vmem:[%s2800_s30 + $0x10] sm:$0xff]   ;;  %v304_v30 = vld [vmem:[%s2813_s7 + $0x58] sm:$0xff]  ;;  %v306_v33 = vld [vmem:[%s2813_s7 + $0x68] sm:$0xff]  ;;  %s2585_s18 = scalar_lea.vmem %s4157_s29, 8192  ;;  %s2664_s10 = smov [#allocation2]  }
  0x20   : > { %468 = vmatpush1.bf16.msra.mxu0 %v2185_v11  ;;  %581 = vmatpush1.bf16.msra.mxu1 %v2186_v12  ;;  %v303_v31 = vld [vmem:[%s2813_s7 + $0x50] sm:$0xff]  ;;  %v2196_v32 = vld [vmem:[%s2800_s30 + $0x18] sm:$0xff]   ;;  %v305_v34 = vld [vmem:[%s2813_s7 + $0x60] sm:$0xff]  ;;  %p2586_p12 = scmp.ne.s32.totalorder %s4157_s29, %s2585_s18  ;;  %s2589_s11 = sshll.u32 %s2664_s10, 4  ;;  %s2590_s11 = int_to_ptr.vmem [resolvable:$false] %s2589_s11 }
  0x21   : > { %469 = vmatprep.subr.bf16.mxu0 %v2187_v13  ;;  %582 = vmatprep.subr.bf16.mxu1 %v2189_v14  ;;  %v308_v35 = vld [vmem:[%s2813_s7 + $0x78] sm:$0xff]  ;;  %v307_v36 = vld [vmem:[%s2813_s7 + $0x70] sm:$0xff]  ;;  %v2197_v37 = vld [vmem:[%s2800_s30 + $0x20] sm:$0xff]   ;;  %s2591_s12 = scalar_lea.vmem %s2590_s11, 16384  ;;  %p2592_p1 = scmp.lt.s32.totalorder %s4157_s29, %s2590_s11 }
  0x22   : > { %688 = vperm.xlu0 %2167, %v294_v20   ;;  %698 = vperm.xlu1 %2168, %v296_v21   ;;  %v2198_v38 = vld [vmem:[%s2800_s30 + $0x28] sm:$0xff]   ;;  %v2199_v39 = vld [vmem:[%s2800_s30 + $0x30] sm:$0xff]   ;;  %v2200_v40 = vld [vmem:[%s2800_s30 + $0x38] sm:$0xff]   ;;  %p2587_p13 = pnand %p2586_p12, %p2732_p4  ;;  %p2593_p2 = scmp.lt.s32.totalorder %s2591_s12, %s2585_s18 }
  0x23   : > { %v309_v49 = vld [vmem:[%s4210_s3] sm:$0xf] }
  0x24   : > { %470 = vmatpush1.bf16.msra.mxu0 %v2191_v15  ;;  %583 = vmatpush1.bf16.msra.mxu1 %v2192_v16  ;;  %v2877_v54 = vrot.slane %v309_v49, %v764_v48  ;;  %v2879_v55 = vrot.slane %v309_v49, %v772_v50  ;;  %v2881_v56 = vrot.slane %v309_v49, %v768_v51  ;;  %p2588_p0 = pneg %p2587_p13  ;;  %p2594_p3 = por %p2593_p2, %p2592_p1 }
  0x25   : > { %v2883_v57 = vrot.slane %v309_v49, %v776_v52 }
  0x26   : > { %708 = vperm.xlu1 %2168, %v298_v23   ;;  %703 = vperm.xlu0 %2167, %v297_v24   ;;  %p2595_p5 = pnand %p2594_p3, %p2588_p0 }
  0x27   : > { %2085 = vmatmul.mubr.msk.bf16.vlgmr.msra.gmra.mxu0 %vm430_vm0, %v2193_v17  ;;  %2093 = vmatmul.mubr.msk.bf16.vlgmr.msra.gmra.mxu1 %vm430_vm0, %v2193_v17 }
  0x28   : > { %497 = vmatprep.mubr.bf16.mxu0 %v2663_v2  ;;  %610 = vmatprep.mubr.bf16.mxu1 %v2663_v2 }
  0x2a   : > { %718 = vperm.xlu1 %2168, %v300_v25   ;;  %713 = vperm.xlu0 %2167, %v299_v26  }
  0x2e   : > { %728 = vperm.xlu1 %2168, %v302_v28   ;;  %723 = vperm.xlu0 %2167, %v301_v29  }
  0x2f   : > { %2086 = vmatmul.mubr.msk.bf16.gmra.mxu0 %vm430_vm0, %v2194_v22  ;;  %2094 = vmatmul.mubr.msk.bf16.gmra.mxu1 %vm430_vm0, %v2194_v22 }
  0x30   : > { %507 = vmatprep.mubr.bf16.mxu0 %v2663_v2  ;;  %620 = vmatprep.mubr.bf16.mxu1 %v2663_v2 }
  0x32   : > { %738 = vperm.xlu1 %2168, %v304_v30   ;;  %733 = vperm.xlu0 %2167, %v303_v31  }
  0x36   : > { %748 = vperm.xlu1 %2168, %v306_v33   ;;  %743 = vperm.xlu0 %2167, %v305_v34  }
  0x37   : > { %2087 = vmatmul.mubr.msk.bf16.gmra.mxu0 %vm430_vm0, %v2195_v27  ;;  %2095 = vmatmul.mubr.msk.bf16.gmra.mxu1 %vm430_vm0, %v2195_v27 }
  0x38   : > { %517 = vmatprep.mubr.bf16.mxu0 %v2663_v2  ;;  %630 = vmatprep.mubr.bf16.mxu1 %v2663_v2 }
  0x3a   : > { %758 = vperm.xlu1 %2168, %v308_v35   ;;  %753 = vperm.xlu0 %2167, %v307_v36  }
  0x3f   : > { %2088 = vmatmul.mubr.msk.bf16.gmra.mxu0 %vm430_vm0, %v2196_v32  ;;  %2096 = vmatmul.mubr.msk.bf16.gmra.mxu1 %vm430_vm0, %v2196_v32 }
  0x40   : > { %527 = vmatprep.mubr.bf16.mxu0 %v2663_v2  ;;  %640 = vmatprep.mubr.bf16.mxu1 %v2663_v2 }
  0x47   : > { %2089 = vmatmul.mubr.msk.bf16.gmra.mxu0 %vm430_vm0, %v2197_v37  ;;  %2097 = vmatmul.mubr.msk.bf16.gmra.mxu1 %vm430_vm0, %v2197_v37 }
  0x48   : > { %537 = vmatprep.mubr.bf16.mxu0 %v2663_v2  ;;  %650 = vmatprep.mubr.bf16.mxu1 %v2663_v2 }
  0x4f   : > { %2090 = vmatmul.mubr.msk.bf16.gmra.mxu0 %vm430_vm0, %v2198_v38  ;;  %2098 = vmatmul.mubr.msk.bf16.gmra.mxu1 %vm430_vm0, %v2198_v38 }
  0x50   : > { %547 = vmatprep.mubr.bf16.mxu0 %v2663_v2  ;;  %660 = vmatprep.mubr.bf16.mxu1 %v2663_v2 }
  0x57   : > { %2091 = vmatmul.mubr.msk.bf16.gmra.mxu0 %vm430_vm0, %v2199_v39  ;;  %2099 = vmatmul.mubr.msk.bf16.gmra.mxu1 %vm430_vm0, %v2199_v39 }
  0x58   : > { %557 = vmatprep.mubr.bf16.mxu0 %v2663_v2  ;;  %670 = vmatprep.mubr.bf16.mxu1 %v2663_v2 }
  0x5f   : > { %2092 = vmatmul.mubr.msk.bf16.gmra.mxu0 %vm430_vm0, %v2200_v40  ;;  %2100 = vmatmul.mubr.msk.bf16.gmra.mxu1 %vm430_vm0, %v2200_v40 }
  0x99   : > { %v694_v41 = vpop.permute.xlu1 %693  ;;  %v684_v47 = vpop.permute.xlu0 %683 }
  0x9a   : > { %v782_v59 = vadd.f32 %v2877_v54, %v684_v47  ;;  %v784_v60 = vadd.f32 %v2879_v55, %v684_v47  ;;  %v783_v61 = vadd.f32 %v2881_v56, %v684_v47  ;;  %v785_v62 = vadd.f32 %v2883_v57, %v684_v47 }
  0x9b   : > { %v2890_v63 = vadd.f32 %v2877_v54, %v694_v41  ;;  %v2898_v5 = vadd.f32 %v2879_v55, %v694_v41  ;;  %v2901_v6 = vadd.f32 %v2881_v56, %v694_v41  ;;  %v2904_v7 = vadd.f32 %v2883_v57, %v694_v41 }
  0x9d   : > { %v699_v42 = vpop.permute.xlu1 %698  ;;  %v689_v58 = vpop.permute.xlu0 %688 }
  0x9e   : > { %v2895_v4 = vadd.f32 %v2877_v54, %v689_v58  ;;  %v788_v10 = vadd.f32 %v2879_v55, %v689_v58  ;;  %v2908_v11 = vadd.f32 %v2881_v56, %v689_v58  ;;  %v2911_v14 = vadd.f32 %v2883_v57, %v689_v58 }
  0x9f   : > { %v2914_v15 = vadd.f32 %v2877_v54, %v699_v42  ;;  %v2917_v16 = vadd.f32 %v2879_v55, %v699_v42  ;;  %v2920_v17 = vadd.f32 %v2881_v56, %v699_v42  ;;  %v2923_v24 = vadd.f32 %v2883_v57, %v699_v42 }
  0xa1   : > { %v2868_v43 = vpop.permute.xlu1 %708  ;;  %v704_v0 = vpop.permute.xlu0 %703 }
  0xa2   : > { %v2926_v25 = vadd.f32 %v2877_v54, %v704_v0  ;;  %v2929_v26 = vadd.f32 %v2879_v55, %v704_v0  ;;  %v2932_v27 = vadd.f32 %v2881_v56, %v704_v0  ;;  %v2941_v38 = vadd.f32 %v2883_v57, %v704_v0 }
  0xa3   : > { %v2945_v39 = vadd.f32 %v2877_v54, %v2868_v43  ;;  %v2950_v40 = vadd.f32 %v2879_v55, %v2868_v43  ;;  %v2954_v41 = vadd.f32 %v2881_v56, %v2868_v43  ;;  %v2958_v42 = vadd.f32 %v2883_v57, %v2868_v43 }
  0xa5   : > { %v2870_v46 = vpop.permute.xlu1 %718  ;;  %v714_v32 = vpop.permute.xlu0 %713 }
  0xa6   : > { %v2962_v47 = vadd.f32 %v2877_v54, %v714_v32  ;;  %v2965_v48 = vadd.f32 %v2879_v55, %v714_v32  ;;  %v2968_v49 = vadd.f32 %v2881_v56, %v714_v32  ;;  %v2979_v0 = vadd.f32 %v2883_v57, %v714_v32 }
  0xa9   : > { %v2875_v53 = vpop.permute.xlu1 %728 }
  0xad   : > { %v2892_v1 = vpop.permute.xlu1 %738 }
  0xb1   : > { %v2938_v33 = vpop.permute.xlu1 %748 }
  0xe7   : > { %v489_v2 = vpop.f32.mrf.mxu0  ;;  %v602_v3 = vpop.f32.mrf.mxu1 }
  0xe8   : > { %v846_v8 = vmul.f32 2.0, %v489_v2  ;;  %v848_v9 = vmul.f32 2.0, %v602_v3  ;;  %v2983_v2 = vadd.f32 %v2877_v54, %v2870_v46  ;;  %v2987_v3 = vadd.f32 %v2879_v55, %v2870_v46 }
  0xe9   : > { %v491_v12 = vpop.f32.mrf.mxu0  ;;  %v604_v13 = vpop.f32.mrf.mxu1 }
  0xea   : > { %v910_v18 = vsub.f32 %v782_v59, %v846_v8  ;;  %v912_v19 = vsub.f32 %v784_v60, %v848_v9  ;;  %v847_v20 = vmul.f32 2.0, %v491_v12  ;;  %v849_v21 = vmul.f32 2.0, %v604_v13 }
  0xeb   : > { %v493_v22 = vpop.f32.mrf.mxu0  ;;  %v606_v23 = vpop.f32.mrf.mxu1  ;;  %v2994_v9 = vadd.f32 %v2881_v56, %v2870_v46 }
  0xec   : > { %v2934_v28 = vmax.f32 %v910_v18, 0.0  ;;  %v2936_v29 = vmax.f32 %v912_v19, 0.0  ;;  %v911_v30 = vsub.f32 %v783_v61, %v847_v20  ;;  %v913_v31 = vsub.f32 %v785_v62, %v849_v21  ;;  %v2976_v62 = vpop.permute.xlu0 %723 }
  0xed   : > { %v850_v34 = vmul.f32 2.0, %v493_v22  ;;  %v852_v35 = vmul.f32 2.0, %v606_v23  ;;  %v495_v36 = vpop.f32.mrf.mxu0  ;;  %v608_v37 = vpop.f32.mrf.mxu1  ;;  %v3002_v12 = vadd.f32 %v2877_v54, %v2976_v62 }
  0xee   : > { %2201 = vrsqrt.f32 %v2934_v28  ;;  %v2970_v50 = vmax.f32 %v911_v30, 0.0  ;;  %v2972_v51 = vmax.f32 %v913_v31, 0.0  ;;  %v851_v58 = vmul.f32 2.0, %v495_v36 }
  0xef   : > { %2203 = vrsqrt.f32 %v2936_v29  ;;  %v499_v44 = vpop.f32.mrf.mxu0  ;;  %v612_v45 = vpop.f32.mrf.mxu1  ;;  %v914_v43 = vsub.f32 %v2895_v4, %v850_v34  ;;  %v916_v52 = vsub.f32 %v788_v10, %v852_v35  ;;  %v853_v59 = vmul.f32 2.0, %v608_v37 }
  0xf0   : > { %v854_v60 = vmul.f32 2.0, %v499_v44  ;;  %v856_v61 = vmul.f32 2.0, %v612_v45  ;;  %2205 = vrsqrt.f32 %v2970_v50  ;;  %v2989_v4 = vpop.permute.xlu1 %758  ;;  %v2998_v10 = vadd.f32 %v2883_v57, %v2870_v46 }
  0xf1   : > { %4215 = vst [vmem:[#allocation5_spill] sm:$0xff] %v2989_v4  ;;  %2207 = vrsqrt.f32 %v2972_v51  ;;  %v501_v8 = vpop.f32.mrf.mxu0  ;;  %v3004_v13 = vmax.f32 %v914_v43, 0.0  ;;  %v3006_v18 = vmax.f32 %v916_v52, 0.0  ;;  %v915_v19 = vsub.f32 %v2908_v11, %v851_v58  ;;  %v614_v21 = vpop.f32.mrf.mxu1 }
  0xf2   : > { %v917_v20 = vsub.f32 %v2911_v14, %v853_v59  ;;  %v918_v22 = vsub.f32 %v2890_v63, %v854_v60  ;;  %v920_v23 = vsub.f32 %v2898_v5, %v856_v61  ;;  %v3014_v46 = vadd.f32 %v2879_v55, %v2976_v62 }
  0xf3   : > { %v3018_v30 = vadd.f32 %v2877_v54, %v2989_v4  ;;  %2209 = vrsqrt.f32 %v3004_v13  ;;  %v855_v31 = vmul.f32 2.0, %v501_v8  ;;  %v3023_v11 = vadd.f32 %v2881_v56, %v2989_v4  ;;  %v503_v58 = vpop.f32.mrf.mxu0 }
  0xf4   : > { %v3027_v63 = vadd.f32 %v2879_v55, %v2989_v4  ;;  %vm1040_vm1 = vcmp.eq.f32.partialorder %v2934_v28, inf  ;;  %vm1042_vm2 = vcmp.eq.f32.partialorder %v2934_v28, 0.0  ;;  %2211 = vrsqrt.f32 %v3006_v18 }
  0xf5   : > { %4216 = vst [vmem:[#allocation6_spill] sm:$0xff] %v3018_v30  ;;  %4217 = vst [vmem:[#allocation7_spill] sm:$0xff] %v3023_v11  ;;  %v857_v5 = vmul.f32 2.0, %v614_v21  ;;  %v1043_v14 = vand.u32 2147483648, %v2934_v28  ;;  %v3033_v32 = vmax.f32 %v915_v19, 0.0  ;;  %v3035_v34 = vmax.f32 %v917_v20, 0.0 }
  0xf6   : > { %4218 = vst [vmem:[#allocation8_spill] sm:$0xff] %v3027_v63  ;;  %v3037_v35 = vmax.f32 %v918_v22, 0.0  ;;  %vm1054_vm3 = vcmp.eq.f32.partialorder %v2936_v29, inf  ;;  %vm1056_vm4 = vcmp.eq.f32.partialorder %v2936_v29, 0.0  ;;  %v1057_v36 = vand.u32 2147483648, %v2936_v29 }
  0xf7   : > { %v3042_v37 = vmax.f32 %v920_v23, 0.0  ;;  %vm1047_vm5 = vcmp.eq.f32.partialorder %v2970_v50, inf  ;;  %vm1049_vm6 = vcmp.eq.f32.partialorder %v2970_v50, 0.0  ;;  %2213 = vrsqrt.f32 %v3033_v32 }
  0xf8   : > { %v919_v44 = vsub.f32 %v2901_v6, %v855_v31  ;;  %v1050_v43 = vand.u32 2147483648, %v2970_v50  ;;  %vm1061_vm7 = vcmp.eq.f32.partialorder %v2972_v51, inf  ;;  %2215 = vrsqrt.f32 %v3035_v34  ;;  %v616_v6 = vpop.f32.mrf.mxu1 }
  0xf9   : > { %v921_v52 = vsub.f32 %v2904_v7, %v857_v5  ;;  %vm1063_vm8 = vcmp.eq.f32.partialorder %v2972_v51, 0.0  ;;  %v1064_v61 = vand.u32 2147483648, %v2972_v51  ;;  %2217 = vrsqrt.f32 %v3037_v35 }
  0xfa   : > { %vm1068_vm9 = vcmp.eq.f32.partialorder %v3004_v13, inf  ;;  %v1071_v19 = vand.u32 2147483648, %v3004_v13  ;;  %2219 = vrsqrt.f32 %v3042_v37  ;;  %vm1070_vm10 = vcmp.eq.f32.partialorder %v3004_v13, 0.0 }
  0xfb   : > { %v2202_v45 = vpop.eup %2201  ;;  %vm1082_vm11 = vcmp.eq.f32.partialorder %v3006_v18, inf  ;;  %v1085_v20 = vand.u32 2147483648, %v3006_v18  ;;  %v3066_v21 = vmax.f32 %v919_v44, 0.0  ;;  %v858_v22 = vmul.f32 2.0, %v503_v58 }
  0xfc   : > { %v2204_v59 = vpop.eup %2203  ;;  %v1039_v60 = vmul.f32 %v2202_v45, %v2934_v28  ;;  %vm1084_vm12 = vcmp.eq.f32.partialorder %v3006_v18, 0.0  ;;  %v3074_v45 = vmax.f32 %v921_v52, 0.0  ;;  %vm1075_vm13 = vcmp.eq.f32.partialorder %v3033_v32, inf }
  0xfd   : > { %v1053_v8 = vmul.f32 %v2204_v59, %v2936_v29  ;;  %v2206_v23 = vpop.eup %2205  ;;  %v3076_v59 = vmul.f32 2.0, %v616_v6  ;;  %2221 = vrsqrt.f32 %v3066_v21  ;;  %v1092_v52 = vand.u32 2147483648, %v3035_v34 }
  0xfe   : > { %v1041_v7 = vsel %vm1040_vm1, %v2934_v28, %v1039_v60  ;;  %v2208_v60 = vpop.eup %2207  ;;  %v1046_v58 = vmul.f32 %v2206_v23, %v2970_v50  ;;  %vm1077_vm14 = vcmp.eq.f32.partialorder %v3033_v32, 0.0  ;;  %vm1089_vm15 = vcmp.eq.f32.partialorder %v3035_v34, inf }
  0xff   : > { %v1044_v31 = vsel %vm1042_vm2, %v1043_v14, %v1041_v7  ;;  %v1055_v5 = vsel %vm1054_vm3, %v2936_v29, %v1053_v8  ;;  %v1060_v14 = vmul.f32 %v2208_v60, %v2972_v51  ;;  %v1078_v8 = vand.u32 2147483648, %v3033_v32 }
 0x100   : > { %v1486_v4 = vsub.f32 0.0, %v1044_v31  ;;  %v1058_v44 = vsel %vm1056_vm4, %v1057_v36, %v1055_v5  ;;  %v1048_v7 = vsel %vm1047_vm5, %v2970_v50, %v1046_v58  ;;  %2223 = vrsqrt.f32 %v3074_v45  ;;  %v2210_v36 = vpop.eup %2209  ;;  %v3108_v58 = vpop.permute.xlu0 %733 }
 0x101   : > { %v1488_v28 = vsub.f32 0.0, %v1058_v44  ;;  %v922_v29 = vsub.f32 %v2914_v15, %v858_v22  ;;  %v1051_v31 = vsel %vm1049_vm6, %v1050_v43, %v1048_v7  ;;  %vm1091_vm0 = vcmp.eq.f32.partialorder %v3035_v34, 0.0  ;;  %v2212_v60 = vpop.eup %2211 }
 0x102   : > { %v1550_v6 = vmul.f32 1.442695, %v1486_v4  ;;  %v1062_v4 = vsel %vm1061_vm7, %v2972_v51, %v1060_v14  ;;  %vm1096_vm1 = vcmp.eq.f32.partialorder %v3037_v35, inf  ;;  %v1099_v5 = vand.u32 2147483648, %v3037_v35 }
 0x103   : > { %v1554_v23 = vmul.f32 1.442695, %v1488_v28  ;;  %v1487_v44 = vsub.f32 0.0, %v1051_v31  ;;  %v1065_v15 = vsel %vm1063_vm8, %v1064_v61, %v1062_v4  ;;  %v1067_v22 = vmul.f32 %v2210_v36, %v3004_v13 }
 0x104   : > { %2225 = vpow2.f32 %v1550_v6  ;;  %vm1098_vm2 = vcmp.eq.f32.partialorder %v3037_v35, 0.0  ;;  %vm1110_vm3 = vcmp.eq.f32.partialorder %v3042_v37, inf  ;;  %v1489_v50 = vsub.f32 0.0, %v1065_v15  ;;  %v2214_v6 = vpop.eup %2213 }
 0x105   : > { %2227 = vpow2.f32 %v1554_v23  ;;  %v1081_v43 = vmul.f32 %v2212_v60, %v3006_v18  ;;  %vm1112_vm4 = vcmp.eq.f32.partialorder %v3042_v37, 0.0  ;;  %v1552_v28 = vmul.f32 1.442695, %v1487_v44  ;;  %v2216_v4 = vpop.eup %2215 }
 0x106   : > { %v1069_v51 = vsel %vm1068_vm9, %v3004_v13, %v1067_v22  ;;  %v1113_v61 = vand.u32 2147483648, %v3042_v37  ;;  %v3114_v14 = vmax.f32 %v922_v29, 0.0  ;;  %v1556_v7 = vmul.f32 1.442695, %v1489_v50  ;;  %v2218_v13 = vpop.eup %2217 }
 0x107   : > { %v1072_v36 = vsel %vm1070_vm10, %v1071_v19, %v1069_v51  ;;  %v1083_v23 = vsel %vm1082_vm11, %v3006_v18, %v1081_v43  ;;  %vm1103_vm5 = vcmp.eq.f32.partialorder %v3066_v21, inf  ;;  %v1106_v31 = vand.u32 2147483648, %v3066_v21  ;;  %v2220_v22 = vpop.eup %2219 }
 0x108   : > { %2229 = vpow2.f32 %v1552_v28  ;;  %v1490_v60 = vsub.f32 0.0, %v1072_v36  ;;  %v1086_v29 = vsel %vm1084_vm12, %v1085_v20, %v1083_v23  ;;  %v1074_v44 = vmul.f32 %v2214_v6, %v3033_v32 }
 0x109   : > { %vm1105_vm6 = vcmp.eq.f32.partialorder %v3066_v21, 0.0  ;;  %2231 = vpow2.f32 %v1556_v7  ;;  %v1492_v19 = vsub.f32 0.0, %v1086_v29  ;;  %v1088_v15 = vmul.f32 %v2216_v4, %v3035_v34  ;;  %v3140_v7 = vpop.permute.xlu0 %743 }
 0x10a   : > { %vm1117_vm7 = vcmp.eq.f32.partialorder %v3074_v45, inf  ;;  %v1558_v50 = vmul.f32 1.442695, %v1490_v60  ;;  %v1076_v43 = vsel %vm1075_vm13, %v3033_v32, %v1074_v44  ;;  %v1095_v18 = vmul.f32 %v2218_v13, %v3037_v35  ;;  %v2222_v60 = vpop.eup %2221 }
 0x10b   : > { %2233 = vrsqrt.f32 %v3114_v14  ;;  %v1562_v20 = vmul.f32 1.442695, %v1492_v19  ;;  %v1079_v28 = vsel %vm1077_vm14, %v1078_v8, %v1076_v43  ;;  %v1090_v51 = vsel %vm1089_vm15, %v3035_v34, %v1088_v15 }
 0x10c   : > { %v1109_v6 = vmul.f32 %v2220_v22, %v3042_v37  ;;  %2235 = vpow2.f32 %v1558_v50  ;;  %v1491_v36 = vsub.f32 0.0, %v1079_v28  ;;  %v1093_v23 = vsel %vm1091_vm0, %v1092_v52, %v1090_v51 }
 0x10d   : > { %v1097_v4 = vsel %vm1096_vm1, %v3037_v35, %v1095_v18  ;;  %2237 = vpow2.f32 %v1562_v20  ;;  %v1493_v32 = vsub.f32 0.0, %v1093_v23  ;;  %v1102_v52 = vmul.f32 %v2222_v60, %v3066_v21  ;;  %v2224_v19 = vpop.eup %2223  ;;  %v3167_v51 = vpop.permute.xlu0 %753 }
 0x10e   : > { %v1100_v8 = vsel %vm1098_vm2, %v1099_v5, %v1097_v4  ;;  %v1111_v29 = vsel %vm1110_vm3, %v3042_v37, %v1109_v6  ;;  %v1560_v44 = vmul.f32 1.442695, %v1491_v36  ;;  %vm1119_vm8 = vcmp.eq.f32.partialorder %v3074_v45, 0.0  ;;  %v505_v5 = vpop.f32.mrf.mxu0  ;;  %v618_v23 = vpop.f32.mrf.mxu1 }
 0x10f   : > { %v1494_v13 = vsub.f32 0.0, %v1100_v8  ;;  %v1114_v34 = vsel %vm1112_vm4, %v1113_v61, %v1111_v29  ;;  %v1564_v15 = vmul.f32 1.442695, %v1493_v32  ;;  %v924_v35 = vsub.f32 %v2917_v16, %v3076_v59 }
 0x110   : > { %v1496_v22 = vsub.f32 0.0, %v1114_v34  ;;  %2239 = vpow2.f32 %v1560_v44  ;;  %v1104_v43 = vsel %vm1103_vm5, %v3066_v21, %v1102_v52  ;;  %v1116_v37 = vmul.f32 %v2224_v19, %v3074_v45  ;;  %v509_v60 = vpop.f32.mrf.mxu0 }
 0x111   : > { %v1566_v50 = vmul.f32 1.442695, %v1494_v13  ;;  %v3162_v61 = vpop.eup %2225  ;;  %2241 = vpow2.f32 %v1564_v15  ;;  %v1107_v20 = vsel %vm1105_vm6, %v1106_v31, %v1104_v43  ;;  %v1120_v28 = vand.u32 2147483648, %v3074_v45 }
 0x112   : > { %v1570_v18 = vmul.f32 1.442695, %v1496_v22  ;;  %v3169_v16 = vpop.eup %2227  ;;  %v1678_v59 = vadd.f32 1.0, %v3162_v61  ;;  %v1495_v6 = vsub.f32 0.0, %v1107_v20  ;;  %v1118_v36 = vsel %vm1117_vm7, %v3074_v45, %v1116_v37 }
 0x113   : > { %2243 = vpow2.f32 %v1566_v50  ;;  %v1680_v4 = vadd.f32 1.0, %v3169_v16  ;;  %v1121_v21 = vsel %vm1119_vm8, %v1120_v28, %v1118_v36  ;;  %v3178_v31 = vmax.f32 %v924_v35, 0.0 }
 0x114   : > { %2245 = vpow2.f32 %v1570_v18  ;;  %v1568_v32 = vmul.f32 1.442695, %v1495_v6  ;;  %v1497_v8 = vsub.f32 0.0, %v1121_v21  ;;  %v3182_v29 = vadd.f32 %v2877_v54, %v3167_v51  ;;  %v511_v6 = vpop.f32.mrf.mxu0 }
 0x115   : > { %2247 = vrcp.f32 %v1678_v59  ;;  %v3184_v44 = vpop.eup %2229  ;;  %v859_v13 = vmul.f32 2.0, %v505_v5  ;;  %v861_v34 = vmul.f32 2.0, %v618_v23  ;;  %v3188_v52 = vadd.f32 %v2881_v56, %v3167_v51 }
 0x116   : > { %2249 = vrcp.f32 %v1680_v4  ;;  %v3190_v45 = vpop.eup %2231  ;;  %v1679_v19 = vadd.f32 1.0, %v3184_v44  ;;  %v1572_v15 = vmul.f32 1.442695, %v1497_v8  ;;  %v862_v22 = vmul.f32 2.0, %v509_v60 }
 0x117   : > { %4219 = vst [vmem:[#allocation9_spill] sm:$0xff] %v3188_v52  ;;  %2251 = vpow2.f32 %v1568_v32  ;;  %v1681_v50 = vadd.f32 1.0, %v3190_v45  ;;  %v923_v43 = vsub.f32 %v2920_v17, %v859_v13  ;;  %v925_v5 = vsub.f32 %v2923_v24, %v861_v34  ;;  %v622_v17 = vpop.f32.mrf.mxu1 }
 0x118   : > { %v2234_v35 = vpop.eup %2233  ;;  %2253 = vrsqrt.f32 %v3178_v31  ;;  %vm1124_vm9 = vcmp.eq.f32.partialorder %v3114_v14, inf  ;;  %v926_v18 = vsub.f32 %v2926_v25, %v862_v22  ;;  %vm1126_vm10 = vcmp.eq.f32.partialorder %v3114_v14, 0.0 }
 0x119   : > { %2255 = vrcp.f32 %v1679_v19  ;;  %v1123_v37 = vmul.f32 %v2234_v35, %v3114_v14  ;;  %v3200_v20 = vpop.eup %2235  ;;  %v1127_v28 = vand.u32 2147483648, %v3114_v14  ;;  %v3204_v59 = vmax.f32 %v923_v43, 0.0  ;;  %v513_v43 = vpop.f32.mrf.mxu0 }
 0x11a   : > { %2257 = vrcp.f32 %v1681_v50  ;;  %v3206_v24 = vpop.eup %2237  ;;  %v1682_v36 = vadd.f32 1.0, %v3200_v20  ;;  %v3210_v4 = vmax.f32 %v925_v5, 0.0  ;;  %v3215_v60 = vmax.f32 %v926_v18, 0.0  ;;  %v624_v50 = vpop.f32.mrf.mxu1 }
 0x11b   : > { %2259 = vpow2.f32 %v1572_v15  ;;  %v1125_v23 = vsel %vm1124_vm9, %v3114_v14, %v1123_v37  ;;  %v1684_v25 = vadd.f32 1.0, %v3206_v24  ;;  %v864_v8 = vmul.f32 2.0, %v622_v17 }
 0x11c   : > { %v1128_v21 = vsel %vm1126_vm10, %v1127_v28, %v1125_v23  ;;  %2261 = vrsqrt.f32 %v3204_v59  ;;  %v863_v13 = vmul.f32 2.0, %v511_v6  ;;  %v3221_v14 = vadd.f32 %v2879_v55, %v3167_v51 }
 0x11d   : > { %2263 = vrcp.f32 %v1682_v36  ;;  %v1498_v32 = vsub.f32 0.0, %v1128_v21  ;;  %v3217_v34 = vpop.eup %2239  ;;  %v3225_v19 = vadd.f32 %v2881_v56, %v2976_v62  ;;  %v3229_v15 = vadd.f32 %v2883_v57, %v2976_v62 }
 0x11e   : > { %2265 = vrcp.f32 %v1684_v25  ;;  %v3231_v22 = vpop.eup %2241  ;;  %v1683_v35 = vadd.f32 1.0, %v3217_v34  ;;  %vm1138_vm11 = vcmp.eq.f32.partialorder %v3178_v31, inf  ;;  %v3242_v5 = vadd.f32 %v2877_v54, %v2875_v53 }
 0x11f   : > { %2267 = vrsqrt.f32 %v3210_v4  ;;  %v1685_v62 = vadd.f32 1.0, %v3231_v22  ;;  %v1574_v18 = vmul.f32 1.442695, %v1498_v32  ;;  %vm1140_vm12 = vcmp.eq.f32.partialorder %v3178_v31, 0.0 }
 0x120   : > { %v3244_v37 = vpop.eup %2243  ;;  %2269 = vrsqrt.f32 %v3215_v60  ;;  %v928_v6 = vsub.f32 %v2929_v26, %v864_v8  ;;  %v927_v36 = vsub.f32 %v2932_v27, %v863_v13  ;;  %v865_v21 = vmul.f32 2.0, %v624_v50 }
 0x121   : > { %v3249_v28 = vpop.eup %2245  ;;  %2271 = vrcp.f32 %v1683_v35  ;;  %v1686_v17 = vadd.f32 1.0, %v3244_v37  ;;  %v866_v32 = vmul.f32 2.0, %v513_v43  ;;  %v1141_v30 = vand.u32 2147483648, %v3178_v31 }
 0x122   : > { %v2248_v23 = vpop.eup %2247  ;;  %2273 = vrcp.f32 %v1685_v62  ;;  %v1688_v25 = vadd.f32 1.0, %v3249_v28  ;;  %v3257_v35 = vmax.f32 %v928_v6, 0.0  ;;  %v3262_v27 = vmax.f32 %v927_v36, 0.0  ;;  %v626_v6 = vpop.f32.mrf.mxu1 }
 0x123   : > { %v2250_v11 = vpop.eup %2249  ;;  %v1806_v63 = vmul.f32 %v2248_v23, %v3162_v61  ;;  %2275 = vrcp.f32 %v1686_v17  ;;  %v929_v8 = vsub.f32 %v2941_v38, %v865_v21  ;;  %vm1131_vm13 = vcmp.eq.f32.partialorder %v3204_v59, inf }
 0x124   : > { %v3259_v52 = vpop.eup %2251  ;;  %v1808_v26 = vmul.f32 %v2250_v11, %v3169_v16  ;;  %2277 = vrcp.f32 %v1688_v25  ;;  %v930_v50 = vsub.f32 %v2945_v39, %v866_v32  ;;  %vm1133_vm14 = vcmp.eq.f32.partialorder %v3204_v59, 0.0 }
 0x125   : > { %v2254_v13 = vpop.eup %2253  ;;  %1870 = vst [vmem:[%s3266_s24] sm:$0xff] %v1806_v63  ;;  %v1687_v61 = vadd.f32 1.0, %v3259_v52  ;;  %2279 = vpow2.f32 %v1574_v18  ;;  %v1134_v38 = vand.u32 2147483648, %v3204_v59  ;;  %vm1145_vm15 = vcmp.eq.f32.partialorder %v3210_v4, inf }
 0x126   : > { %v2256_v43 = vpop.eup %2255  ;;  %1872 = vst [vmem:[%s3266_s24 + $0x10] sm:$0xff] %v1808_v26  ;;  %v1137_v11 = vmul.f32 %v2254_v13, %v3178_v31  ;;  %2281 = vrsqrt.f32 %v3257_v35  ;;  %vm1147_vm0 = vcmp.eq.f32.partialorder %v3210_v4, 0.0  ;;  %v3287_v17 = vmax.f32 %v929_v8, 0.0 }
 0x127   : > { %v2258_v16 = vpop.eup %2257  ;;  %v1807_v63 = vmul.f32 %v2256_v43, %v3184_v44  ;;  %2283 = vrcp.f32 %v1687_v61  ;;  %v1148_v25 = vand.u32 2147483648, %v3210_v4  ;;  %v3294_v21 = vmax.f32 %v930_v50, 0.0 }
 0x128   : > { %v3280_v39 = vpop.eup %2259  ;;  %v1809_v62 = vmul.f32 %v2258_v16, %v3190_v45  ;;  %v1139_v18 = vsel %vm1138_vm11, %v3178_v31, %v1137_v11  ;;  %2285 = vrsqrt.f32 %v3262_v27  ;;  %vm1152_vm1 = vcmp.eq.f32.partialorder %v3215_v60, inf  ;;  %v515_v11 = vpop.f32.mrf.mxu0 }
 0x129   : > { %v2262_v44 = vpop.eup %2261  ;;  %1871 = vst [vmem:[%s3266_s24 + $0x8] sm:$0xff] %v1807_v63  ;;  %v1689_v36 = vadd.f32 1.0, %v3280_v39  ;;  %v1142_v23 = vsel %vm1140_vm12, %v1141_v30, %v1139_v18  ;;  %2287 = vrsqrt.f32 %v3287_v17  ;;  %vm1154_vm2 = vcmp.eq.f32.partialorder %v3215_v60, 0.0 }
 0x12a   : > { %v2264_v45 = vpop.eup %2263  ;;  %1873 = vst [vmem:[%s3266_s24 + $0x18] sm:$0xff] %v1809_v62  ;;  %v1500_v32 = vsub.f32 0.0, %v1142_v23  ;;  %v1130_v26 = vmul.f32 %v2262_v44, %v3204_v59  ;;  %v868_v30 = vmul.f32 2.0, %v626_v6  ;;  %v1155_v62 = vand.u32 2147483648, %v3215_v60 }
 0x12b   : > { %v2266_v8 = vpop.eup %2265  ;;  %v1810_v13 = vmul.f32 %v2264_v45, %v3200_v20  ;;  %2289 = vrcp.f32 %v1689_v36  ;;  %vm1166_vm3 = vcmp.eq.f32.partialorder %v3257_v35, inf  ;;  %vm1168_vm4 = vcmp.eq.f32.partialorder %v3257_v35, 0.0 }
 0x12c   : > { %v2268_v31 = vpop.eup %2267  ;;  %v1812_v61 = vmul.f32 %v2266_v8, %v3206_v24  ;;  %v1578_v50 = vmul.f32 1.442695, %v1500_v32  ;;  %v1132_v43 = vsel %vm1131_vm13, %v3204_v59, %v1130_v26  ;;  %2291 = vrsqrt.f32 %v3294_v21 }
 0x12d   : > { %v2270_v16 = vpop.eup %2269  ;;  %1874 = vst [vmem:[%s3266_s24 + $0x20] sm:$0xff] %v1810_v13  ;;  %v1135_v20 = vsel %vm1133_vm14, %v1134_v38, %v1132_v43  ;;  %v1144_v63 = vmul.f32 %v2268_v31, %v3210_v4  ;;  %v1169_v44 = vand.u32 2147483648, %v3257_v35  ;;  %vm1159_vm5 = vcmp.eq.f32.partialorder %v3262_v27, inf }
 0x12e   : > { %v2272_v24 = vpop.eup %2271  ;;  %1876 = vst [vmem:[%s3266_s24 + $0x30] sm:$0xff] %v1812_v61  ;;  %2293 = vpow2.f32 %v1578_v50  ;;  %v1499_v18 = vsub.f32 0.0, %v1135_v20  ;;  %v1151_v6 = vmul.f32 %v2270_v16, %v3215_v60  ;;  %v932_v23 = vsub.f32 %v2950_v40, %v868_v30 }
 0x12f   : > { %v2274_v36 = vpop.eup %2273  ;;  %v1811_v59 = vmul.f32 %v2272_v24, %v3217_v34  ;;  %v1146_v38 = vsel %vm1145_vm15, %v3210_v4, %v1144_v63  ;;  %v867_v45 = vmul.f32 2.0, %v515_v11  ;;  %vm1161_vm6 = vcmp.eq.f32.partialorder %v3262_v27, 0.0  ;;  %v628_v11 = vpop.f32.mrf.mxu1 }
 0x130   : > { %v2276_v32 = vpop.eup %2275  ;;  %v1813_v26 = vmul.f32 %v2274_v36, %v3231_v22  ;;  %v1576_v8 = vmul.f32 1.442695, %v1499_v18  ;;  %v1149_v13 = vsel %vm1147_vm0, %v1148_v25, %v1146_v38  ;;  %v1153_v34 = vsel %vm1152_vm1, %v3215_v60, %v1151_v6 }
 0x131   : > { %v2278_v31 = vpop.eup %2277  ;;  %1875 = vst [vmem:[%s3266_s24 + $0x28] sm:$0xff] %v1811_v59  ;;  %v1814_v61 = vmul.f32 %v2276_v32, %v3244_v37  ;;  %v1501_v40 = vsub.f32 0.0, %v1149_v13  ;;  %v1156_v30 = vsel %vm1154_vm2, %v1155_v62, %v1153_v34  ;;  %v3334_v22 = vmax.f32 %v932_v23, 0.0 }
 0x132   : > { %v3336_v4 = vpop.eup %2279  ;;  %1877 = vst [vmem:[%s3266_s24 + $0x38] sm:$0xff] %v1813_v26  ;;  %v1816_v25 = vmul.f32 %v2278_v31, %v3249_v28  ;;  %2295 = vpow2.f32 %v1576_v8  ;;  %v1502_v50 = vsub.f32 0.0, %v1156_v30  ;;  %v931_v43 = vsub.f32 %v2954_v41, %v867_v45  ;;  %v519_v41 = vpop.f32.mrf.mxu0 }
 0x133   : > { %v2282_v16 = vpop.eup %2281  ;;  %1878 = vst [vmem:[%s3266_s24 + $0x40] sm:$0xff] %v1814_v61  ;;  %v1690_v37 = vadd.f32 1.0, %v3336_v4  ;;  %v1580_v20 = vmul.f32 1.442695, %v1501_v40  ;;  %v1162_v60 = vand.u32 2147483648, %v3262_v27  ;;  %2297 = vrsqrt.f32 %v3334_v22  ;;  %v632_v31 = vpop.f32.mrf.mxu1 }
 0x134   : > { %v2284_v63 = vpop.eup %2283  ;;  %1880 = vst [vmem:[%s3266_s24 + $0x50] sm:$0xff] %v1816_v25  ;;  %v1582_v62 = vmul.f32 1.442695, %v1502_v50  ;;  %v1165_v28 = vmul.f32 %v2282_v16, %v3257_v35  ;;  %vm1173_vm7 = vcmp.eq.f32.partialorder %v3287_v17, inf  ;;  %vm1175_vm8 = vcmp.eq.f32.partialorder %v3287_v17, 0.0 }
 0x135   : > { %v2286_v24 = vpop.eup %2285  ;;  %v1815_v18 = vmul.f32 %v2284_v63, %v3259_v52  ;;  %2299 = vrcp.f32 %v1690_v37  ;;  %v3350_v6 = vmax.f32 %v931_v43, 0.0  ;;  %v869_v36 = vmul.f32 2.0, %v628_v11 }
 0x136   : > { %2301 = vpow2.f32 %v1580_v20  ;;  %v1167_v59 = vsel %vm1166_vm3, %v3257_v35, %v1165_v28  ;;  %v1158_v38 = vmul.f32 %v2286_v24, %v3262_v27  ;;  %v1176_v23 = vand.u32 2147483648, %v3287_v17  ;;  %v2288_v45 = vpop.eup %2287 }
 0x137   : > { %1879 = vst [vmem:[%s3266_s24 + $0x48] sm:$0xff] %v1815_v18  ;;  %2303 = vpow2.f32 %v1582_v62  ;;  %v1170_v32 = vsel %vm1168_vm4, %v1169_v44, %v1167_v59  ;;  %vm1180_vm9 = vcmp.eq.f32.partialorder %v3294_v21, inf  ;;  %v870_v52 = vmul.f32 2.0, %v519_v41  ;;  %v634_v59 = vpop.f32.mrf.mxu1 }
 0x138   : > { %v2290_v26 = vpop.eup %2289  ;;  %v1504_v8 = vsub.f32 0.0, %v1170_v32  ;;  %v1160_v13 = vsel %vm1159_vm5, %v3262_v27, %v1158_v38  ;;  %v1172_v34 = vmul.f32 %v2288_v45, %v3287_v17  ;;  %2305 = vrsqrt.f32 %v3350_v6 }
 0x139   : > { %v2292_v61 = vpop.eup %2291  ;;  %v1817_v40 = vmul.f32 %v2290_v26, %v3280_v39  ;;  %v1163_v35 = vsel %vm1161_vm6, %v1162_v60, %v1160_v13  ;;  %v1183_v44 = vand.u32 2147483648, %v3294_v21  ;;  %v933_v30 = vsub.f32 %v2958_v42, %v869_v36 }
 0x13a   : > { %v1586_v25 = vmul.f32 1.442695, %v1504_v8  ;;  %v1503_v50 = vsub.f32 0.0, %v1163_v35  ;;  %v1174_v43 = vsel %vm1173_vm7, %v3287_v17, %v1172_v34  ;;  %v1179_v11 = vmul.f32 %v2292_v61, %v3294_v21  ;;  %v521_v17 = vpop.f32.mrf.mxu0 }
 0x13b   : > { %v3375_v16 = vpop.eup %2293  ;;  %1881 = vst [vmem:[%s3266_s24 + $0x58] sm:$0xff] %v1817_v40  ;;  %v1177_v39 = vsel %vm1175_vm8, %v1176_v23, %v1174_v43  ;;  %v3380_v27 = vmax.f32 %v933_v30, 0.0  ;;  %v934_v37 = vsub.f32 %v2962_v47, %v870_v52  ;;  %v872_v20 = vmul.f32 2.0, %v632_v31 }
 0x13c   : > { %v1692_v42 = vadd.f32 1.0, %v3375_v16  ;;  %2307 = vpow2.f32 %v1586_v25  ;;  %v1584_v60 = vmul.f32 1.442695, %v1503_v50  ;;  %v1505_v63 = vsub.f32 0.0, %v1177_v39  ;;  %v523_v25 = vpop.f32.mrf.mxu0 }
 0x13d   : > { %v1181_v62 = vsel %vm1180_vm9, %v3294_v21, %v1179_v11  ;;  %vm1182_vm10 = vcmp.eq.f32.partialorder %v3294_v21, 0.0  ;;  %vm1194_vm11 = vcmp.eq.f32.partialorder %v3334_v22, inf  ;;  %2309 = vrsqrt.f32 %v3380_v27 }
 0x13e   : > { %2311 = vrcp.f32 %v1692_v42  ;;  %v1588_v28 = vmul.f32 1.442695, %v1505_v63  ;;  %v1184_v47 = vsel %vm1182_vm10, %v1183_v44, %v1181_v62  ;;  %vm1196_vm12 = vcmp.eq.f32.partialorder %v3334_v22, 0.0 }
 0x13f   : > { %v3391_v41 = vpop.eup %2295  ;;  %2313 = vpow2.f32 %v1584_v60  ;;  %v1506_v24 = vsub.f32 0.0, %v1184_v47  ;;  %v3393_v18 = vmax.f32 %v934_v37, 0.0  ;;  %v936_v36 = vsub.f32 %v2965_v48, %v872_v20 }
 0x140   : > { %v2298_v21 = vpop.eup %2297  ;;  %v1691_v38 = vadd.f32 1.0, %v3391_v41  ;;  %2315 = vpow2.f32 %v1588_v28  ;;  %v1197_v23 = vand.u32 2147483648, %v3334_v22  ;;  %v871_v45 = vmul.f32 2.0, %v521_v17 }
 0x141   : > { %v1590_v32 = vmul.f32 1.442695, %v1506_v24  ;;  %v1193_v52 = vmul.f32 %v2298_v21, %v3334_v22  ;;  %vm1187_vm13 = vcmp.eq.f32.partialorder %v3350_v6, inf  ;;  %2317 = vrsqrt.f32 %v3393_v18 }
 0x142   : > { %v2300_v26 = vpop.eup %2299  ;;  %2319 = vrcp.f32 %v1691_v38  ;;  %vm1189_vm14 = vcmp.eq.f32.partialorder %v3350_v6, 0.0  ;;  %v3402_v48 = vmax.f32 %v936_v36, 0.0  ;;  %v873_v8 = vmul.f32 2.0, %v634_v59 }
 0x143   : > { %v3404_v13 = vpop.eup %2301  ;;  %v1818_v34 = vmul.f32 %v2300_v26, %v3336_v4  ;;  %2321 = vpow2.f32 %v1590_v32  ;;  %v1195_v31 = vsel %vm1194_vm11, %v3334_v22, %v1193_v52  ;;  %v935_v61 = vsub.f32 %v2968_v49, %v871_v45  ;;  %v636_v4 = vpop.f32.mrf.mxu1 }
 0x144   : > { %v3411_v40 = vpop.eup %2303  ;;  %v1693_v35 = vadd.f32 1.0, %v3404_v13  ;;  %v1198_v44 = vsel %vm1196_vm12, %v1197_v23, %v1195_v31  ;;  %v1190_v30 = vand.u32 2147483648, %v3350_v6  ;;  %2323 = vrsqrt.f32 %v3402_v48 }
 0x145   : > { %v2306_v50 = vpop.eup %2305  ;;  %1882 = vst [vmem:[%s3266_s24 + $0x60] sm:$0xff] %v1818_v34  ;;  %v1694_v43 = vadd.f32 1.0, %v3411_v40  ;;  %v1508_v11 = vsub.f32 0.0, %v1198_v44  ;;  %vm1201_vm15 = vcmp.eq.f32.partialorder %v3380_v27, inf  ;;  %vm1203_vm0 = vcmp.eq.f32.partialorder %v3380_v27, 0.0  ;;  %v525_v34 = vpop.f32.mrf.mxu0 }
 0x146   : > { %2325 = vrcp.f32 %v1693_v35  ;;  %v1186_v49 = vmul.f32 %v2306_v50, %v3350_v6  ;;  %v3423_v22 = vmax.f32 %v935_v61, 0.0  ;;  %v937_v39 = vsub.f32 %v2979_v0, %v873_v8 }
 0x147   : > { %2327 = vrcp.f32 %v1694_v43  ;;  %v1594_v37 = vmul.f32 1.442695, %v1508_v11  ;;  %v874_v20 = vmul.f32 2.0, %v523_v25  ;;  %v876_v42 = vmul.f32 2.0, %v636_v4 }
 0x148   : > { %v1188_v60 = vsel %vm1187_vm13, %v3350_v6, %v1186_v49  ;;  %v1204_v63 = vand.u32 2147483648, %v3380_v27  ;;  %vm1208_vm1 = vcmp.eq.f32.partialorder %v3393_v18, inf  ;;  %2329 = vrsqrt.f32 %v3423_v22 }
 0x149   : > { %v3432_v62 = vpop.eup %2307  ;;  %2331 = vpow2.f32 %v1594_v37  ;;  %v1191_v0 = vsel %vm1189_vm14, %v1190_v30, %v1188_v60  ;;  %vm1210_vm2 = vcmp.eq.f32.partialorder %v3393_v18, 0.0  ;;  %v3437_v17 = vmax.f32 %v937_v39, 0.0 }
 0x14a   : > { %v2310_v28 = vpop.eup %2309  ;;  %v1696_v47 = vadd.f32 1.0, %v3432_v62  ;;  %v1507_v24 = vsub.f32 0.0, %v1191_v0  ;;  %v938_v36 = vsub.f32 %v2983_v2, %v874_v20  ;;  %v940_v59 = vsub.f32 %v2987_v3, %v876_v42  ;;  %v529_v0 = vpop.f32.mrf.mxu0 }
 0x14b   : > { %v2312_v21 = vpop.eup %2311  ;;  %v1200_v38 = vmul.f32 %v2310_v28, %v3380_v27  ;;  %v1211_v23 = vand.u32 2147483648, %v3393_v18  ;;  %vm1222_vm3 = vcmp.eq.f32.partialorder %v3402_v48, inf  ;;  %2333 = vrsqrt.f32 %v3437_v17 }
 0x14c   : > { %v3446_v6 = vpop.eup %2313  ;;  %v1820_v45 = vmul.f32 %v2312_v21, %v3375_v16  ;;  %2335 = vrcp.f32 %v1696_v47  ;;  %v1592_v32 = vmul.f32 1.442695, %v1507_v24  ;;  %vm1224_vm4 = vcmp.eq.f32.partialorder %v3402_v48, 0.0 }
 0x14d   : > { %v3450_v2 = vpop.eup %2315  ;;  %v1695_v3 = vadd.f32 1.0, %v3446_v6  ;;  %v1202_v52 = vsel %vm1201_vm15, %v3380_v27, %v1200_v38  ;;  %v1225_v26 = vand.u32 2147483648, %v3402_v48  ;;  %v3457_v8 = vmax.f32 %v938_v36, 0.0  ;;  %v638_v27 = vpop.f32.mrf.mxu1 }
 0x14e   : > { %v2318_v31 = vpop.eup %2317  ;;  %1884 = vst [vmem:[%s3266_s24 + $0x70] sm:$0xff] %v1820_v45  ;;  %v1697_v16 = vadd.f32 1.0, %v3450_v2  ;;  %2337 = vpow2.f32 %v1592_v32  ;;  %v1205_v61 = vsel %vm1203_vm0, %v1204_v63, %v1202_v52  ;;  %v3463_v35 = vmax.f32 %v940_v59, 0.0 }
 0x14f   : > { %v2320_v44 = vpop.eup %2319  ;;  %2339 = vrcp.f32 %v1695_v3  ;;  %v1509_v30 = vsub.f32 0.0, %v1205_v61  ;;  %v1207_v25 = vmul.f32 %v2318_v31, %v3393_v18  ;;  %vm1215_vm5 = vcmp.eq.f32.partialorder %v3423_v22, inf  ;;  %v642_v36 = vpop.f32.mrf.mxu1 }
 0x150   : > { %v3467_v4 = vpop.eup %2321  ;;  %v1819_v50 = vmul.f32 %v2320_v44, %v3391_v41  ;;  %2341 = vrcp.f32 %v1697_v16  ;;  %vm1217_vm6 = vcmp.eq.f32.partialorder %v3423_v22, 0.0  ;;  %v875_v43 = vmul.f32 2.0, %v525_v34 }
 0x151   : > { %v2324_v11 = vpop.eup %2323  ;;  %v1698_v49 = vadd.f32 1.0, %v3467_v4  ;;  %v1596_v39 = vmul.f32 1.442695, %v1509_v30  ;;  %v1209_v37 = vsel %vm1208_vm1, %v3393_v18, %v1207_v25  ;;  %2343 = vrsqrt.f32 %v3457_v8 }
 0x152   : > { %1883 = vst [vmem:[%s3266_s24 + $0x68] sm:$0xff] %v1819_v50  ;;  %v1212_v20 = vsel %vm1210_vm2, %v1211_v23, %v1209_v37  ;;  %v1221_v41 = vmul.f32 %v2324_v11, %v3402_v48  ;;  %v1218_v42 = vand.u32 2147483648, %v3423_v22  ;;  %2345 = vrsqrt.f32 %v3463_v35 }
 0x153   : > { %v2326_v60 = vpop.eup %2325  ;;  %2347 = vrcp.f32 %v1698_v49  ;;  %v1510_v63 = vsub.f32 0.0, %v1212_v20  ;;  %vm1229_vm7 = vcmp.eq.f32.partialorder %v3437_v17, inf  ;;  %vm1231_vm8 = vcmp.eq.f32.partialorder %v3437_v17, 0.0 }
 0x154   : > { %v2328_v28 = vpop.eup %2327  ;;  %v1821_v47 = vmul.f32 %v2326_v60, %v3404_v13  ;;  %2349 = vpow2.f32 %v1596_v39  ;;  %v1223_v18 = vsel %vm1222_vm3, %v3402_v48, %v1221_v41  ;;  %v939_v24 = vsub.f32 %v2994_v9, %v875_v43 }
 0x155   : > { %v2330_v59 = vpop.eup %2329  ;;  %v1822_v21 = vmul.f32 %v2328_v28, %v3411_v40  ;;  %v1598_v38 = vmul.f32 1.442695, %v1510_v63  ;;  %v1226_v23 = vsel %vm1224_vm4, %v1225_v26, %v1223_v18  ;;  %v877_v45 = vmul.f32 2.0, %v638_v27 }
 0x156   : > { %v3492_v32 = vpop.eup %2331  ;;  %1885 = vst [vmem:[%s3266_s24 + $0x78] sm:$0xff] %v1821_v47  ;;  %v1512_v13 = vsub.f32 0.0, %v1226_v23  ;;  %v1214_v3 = vmul.f32 %v2330_v59, %v3423_v22  ;;  %v3496_v52 = vmax.f32 %v939_v24, 0.0  ;;  %v878_v34 = vmul.f32 2.0, %v529_v0 }
 0x157   : > { %1886 = vst [vmem:[%s3266_s24 + $0x80] sm:$0xff] %v1822_v21  ;;  %v1700_v9 = vadd.f32 1.0, %v3492_v32  ;;  %2351 = vpow2.f32 %v1598_v38  ;;  %v941_v40 = vsub.f32 %v2998_v10, %v877_v45  ;;  %v880_v31 = vmul.f32 2.0, %v642_v36  ;;  %v531_v10 = vpop.f32.mrf.mxu0 }
 0x158   : > { %v2334_v16 = vpop.eup %2333  ;;  %v1602_v48 = vmul.f32 1.442695, %v1512_v13  ;;  %v1216_v26 = vsel %vm1215_vm5, %v3423_v22, %v1214_v3  ;;  %v1232_v61 = vand.u32 2147483648, %v3437_v17  ;;  %2353 = vrsqrt.f32 %v3496_v52 }
 0x159   : > { %v2336_v44 = vpop.eup %2335  ;;  %2355 = vrcp.f32 %v1700_v9  ;;  %v1219_v30 = vsel %vm1217_vm6, %v1218_v42, %v1216_v26  ;;  %v1228_v25 = vmul.f32 %v2334_v16, %v3437_v17  ;;  %vm1236_vm9 = vcmp.eq.f32.partialorder %v3457_v8, inf  ;;  %v533_v26 = vpop.f32.mrf.mxu0 }
 0x15a   : > { %v1824_v50 = vmul.f32 %v2336_v44, %v3432_v62  ;;  %2357 = vpow2.f32 %v1602_v48  ;;  %v1511_v43 = vsub.f32 0.0, %v1219_v30  ;;  %vm1238_vm10 = vcmp.eq.f32.partialorder %v3457_v8, 0.0 }
 0x15b   : > { %v3512_v27 = vpop.eup %2337  ;;  %v1230_v11 = vsel %vm1229_vm7, %v3437_v17, %v1228_v25  ;;  %v3517_v49 = vmax.f32 %v941_v40, 0.0  ;;  %v942_v22 = vsub.f32 %v3002_v12, %v878_v34  ;;  %v944_v39 = vsub.f32 %v3014_v46, %v880_v31  ;;  %v644_v17 = vpop.f32.mrf.mxu1 }
 0x15c   : > { %v2340_v37 = vpop.eup %2339  ;;  %1888 = vst [vmem:[%s3266_s24 + $0x90] sm:$0xff] %v1824_v50  ;;  %v1699_v62 = vadd.f32 1.0, %v3512_v27  ;;  %v1600_v20 = vmul.f32 1.442695, %v1511_v43  ;;  %v1233_v41 = vsel %vm1231_vm8, %v1232_v61, %v1230_v11  ;;  %v879_v42 = vmul.f32 2.0, %v531_v10 }
 0x15d   : > { %v2342_v60 = vpop.eup %2341  ;;  %v1823_v63 = vmul.f32 %v2340_v37, %v3446_v6  ;;  %v1513_v0 = vsub.f32 0.0, %v1233_v41  ;;  %v1239_v28 = vand.u32 2147483648, %v3457_v8  ;;  %2359 = vrsqrt.f32 %v3517_v49  ;;  %v646_v61 = vpop.f32.mrf.mxu1 }
 0x15e   : > { %v2344_v12 = vpop.eup %2343  ;;  %v1825_v46 = vmul.f32 %v2342_v60, %v3450_v2  ;;  %2361 = vrcp.f32 %v1699_v62  ;;  %vm1250_vm11 = vcmp.eq.f32.partialorder %v3463_v35, inf  ;;  %vm1252_vm12 = vcmp.eq.f32.partialorder %v3463_v35, 0.0 }
 0x15f   : > { %v2346_v47 = vpop.eup %2345  ;;  %1887 = vst [vmem:[%s3266_s24 + $0x88] sm:$0xff] %v1823_v63  ;;  %2363 = vpow2.f32 %v1600_v20  ;;  %v1604_v18 = vmul.f32 1.442695, %v1513_v0  ;;  %v1235_v6 = vmul.f32 %v2344_v12, %v3457_v8  ;;  %v3533_v24 = vmax.f32 %v942_v22, 0.0 }
 0x160   : > { %v2348_v36 = vpop.eup %2347  ;;  %1889 = vst [vmem:[%s3266_s24 + $0x98] sm:$0xff] %v1825_v46  ;;  %v1249_v59 = vmul.f32 %v2346_v47, %v3463_v35  ;;  %v1253_v2 = vand.u32 2147483648, %v3463_v35  ;;  %v3538_v21 = vmax.f32 %v944_v39, 0.0  ;;  %v943_v38 = vsub.f32 %v3225_v19, %v879_v42 }
 0x161   : > { %v3541_v23 = vpop.eup %2349  ;;  %v1826_v45 = vmul.f32 %v2348_v36, %v3467_v4  ;;  %2365 = vpow2.f32 %v1604_v18  ;;  %v1237_v13 = vsel %vm1236_vm9, %v3457_v8, %v1235_v6  ;;  %v881_v3 = vmul.f32 2.0, %v644_v17 }
 0x162   : > { %v1701_v34 = vadd.f32 1.0, %v3541_v23  ;;  %v1240_v9 = vsel %vm1238_vm10, %v1239_v28, %v1237_v13  ;;  %v1251_v40 = vsel %vm1250_vm11, %v3463_v35, %v1249_v59  ;;  %2367 = vrsqrt.f32 %v3533_v24 }
 0x163   : > { %1890 = vst [vmem:[%s3266_s24 + $0xa0] sm:$0xff] %v1826_v45  ;;  %v1514_v19 = vsub.f32 0.0, %v1240_v9  ;;  %v1254_v4 = vsel %vm1252_vm12, %v1253_v2, %v1251_v40  ;;  %v820_v31 = vadd.f32 %v2879_v55, %v2875_v53  ;;  %v3561_v16 = vadd.f32 %v2881_v56, %v2875_v53 }
 0x164   : > { %v3563_v8 = vpop.eup %2351  ;;  %2369 = vrcp.f32 %v1701_v34  ;;  %v1516_v48 = vsub.f32 0.0, %v1254_v4  ;;  %vm1243_vm13 = vcmp.eq.f32.partialorder %v3496_v52, inf  ;;  %v3568_v44 = vadd.f32 %v2883_v57, %v2875_v53 }
 0x165   : > { %v2354_v35 = vpop.eup %2353  ;;  %v1702_v30 = vadd.f32 1.0, %v3563_v8  ;;  %v1606_v25 = vmul.f32 1.442695, %v1514_v19  ;;  %v1246_v10 = vand.u32 2147483648, %v3496_v52  ;;  %2371 = vrsqrt.f32 %v3538_v21 }
 0x166   : > { %v2356_v50 = vpop.eup %2355  ;;  %v1610_v43 = vmul.f32 1.442695, %v1516_v48  ;;  %v1242_v11 = vmul.f32 %v2354_v35, %v3496_v52  ;;  %v3574_v22 = vmax.f32 %v943_v38, 0.0  ;;  %v945_v39 = vsub.f32 %v3229_v15, %v881_v3  ;;  %v535_v15 = vpop.f32.mrf.mxu0 }
 0x167   : > { %v3577_v37 = vpop.eup %2357  ;;  %v1828_v53 = vmul.f32 %v2356_v50, %v3492_v32  ;;  %2373 = vrcp.f32 %v1702_v30  ;;  %v882_v62 = vmul.f32 2.0, %v533_v26  ;;  %v884_v20 = vmul.f32 2.0, %v646_v61  ;;  %v648_v48 = vpop.f32.mrf.mxu1 }
 0x168   : > { %v1704_v41 = vadd.f32 1.0, %v3577_v37  ;;  %2375 = vpow2.f32 %v1606_v25  ;;  %v1244_v42 = vsel %vm1243_vm13, %v3496_v52, %v1242_v11  ;;  %vm1245_vm14 = vcmp.eq.f32.partialorder %v3496_v52, 0.0  ;;  %v539_v30 = vpop.f32.mrf.mxu0 }
 0x169   : > { %1892 = vst [vmem:[%s3266_s24 + $0xb0] sm:$0xff] %v1828_v53  ;;  %2377 = vpow2.f32 %v1610_v43  ;;  %v1247_v60 = vsel %vm1245_vm14, %v1246_v10, %v1244_v42  ;;  %vm1257_vm15 = vcmp.eq.f32.partialorder %v3517_v49, inf  ;;  %vm1259_vm0 = vcmp.eq.f32.partialorder %v3517_v49, 0.0 }
 0x16a   : > { %v2360_v32 = vpop.eup %2359  ;;  %2379 = vrcp.f32 %v1704_v41  ;;  %v1515_v63 = vsub.f32 0.0, %v1247_v60  ;;  %v3588_v0 = vmax.f32 %v945_v39, 0.0  ;;  %v946_v28 = vsub.f32 %v3242_v5, %v882_v62 }
 0x16b   : > { %v2362_v12 = vpop.eup %2361  ;;  %v1256_v46 = vmul.f32 %v2360_v32, %v3517_v49  ;;  %v1260_v52 = vand.u32 2147483648, %v3517_v49  ;;  %2381 = vrsqrt.f32 %v3574_v22  ;;  %v948_v17 = vsub.f32 %v820_v31, %v884_v20 }
 0x16c   : > { %v3594_v47 = vpop.eup %2363  ;;  %v1827_v18 = vmul.f32 %v2362_v12, %v3512_v27  ;;  %v1608_v6 = vmul.f32 1.442695, %v1515_v63  ;;  %2383 = vrsqrt.f32 %v3588_v0  ;;  %v883_v36 = vmul.f32 2.0, %v535_v15 }
 0x16d   : > { %v1703_v59 = vadd.f32 1.0, %v3594_v47  ;;  %v1258_v5 = vsel %vm1257_vm15, %v3517_v49, %v1256_v46  ;;  %vm1264_vm1 = vcmp.eq.f32.partialorder %v3533_v24, inf  ;;  %vm1266_vm2 = vcmp.eq.f32.partialorder %v3533_v24, 0.0 }
 0x16e   : > { %v3604_v2 = vpop.eup %2365  ;;  %1891 = vst [vmem:[%s3266_s24 + $0xa8] sm:$0xff] %v1827_v18  ;;  %2385 = vpow2.f32 %v1608_v6  ;;  %v1261_v27 = vsel %vm1259_vm0, %v1260_v52, %v1258_v5  ;;  %v3609_v38 = vmax.f32 %v946_v28, 0.0  ;;  %v3611_v45 = vmax.f32 %v948_v17, 0.0 }
 0x16f   : > { %v2368_v13 = vpop.eup %2367  ;;  %2387 = vrcp.f32 %v1703_v59  ;;  %v1705_v3 = vadd.f32 1.0, %v3604_v2  ;;  %v1517_v34 = vsub.f32 0.0, %v1261_v27  ;;  %v1267_v9 = vand.u32 2147483648, %v3533_v24 }
 0x170   : > { %v1263_v40 = vmul.f32 %v2368_v13, %v3533_v24  ;;  %vm1278_vm3 = vcmp.eq.f32.partialorder %v3538_v21, inf  ;;  %2389 = vrsqrt.f32 %v3609_v38  ;;  %v947_v49 = vsub.f32 %v3561_v16, %v883_v36 }
 0x171   : > { %v2370_v19 = vpop.eup %2369  ;;  %2391 = vrcp.f32 %v1705_v3  ;;  %v1612_v4 = vmul.f32 1.442695, %v1517_v34  ;;  %vm1280_vm4 = vcmp.eq.f32.partialorder %v3538_v21, 0.0  ;;  %v1281_v31 = vand.u32 2147483648, %v3538_v21 }
 0x172   : > { %v2372_v26 = vpop.eup %2371  ;;  %v1829_v61 = vmul.f32 %v2370_v19, %v3541_v23  ;;  %v1265_v35 = vsel %vm1264_vm1, %v3533_v24, %v1263_v40  ;;  %vm1271_vm5 = vcmp.eq.f32.partialorder %v3574_v22, inf  ;;  %v1274_v16 = vand.u32 2147483648, %v3574_v22  ;;  %v652_v40 = vpop.f32.mrf.mxu1 }
 0x173   : > { %2393 = vrsqrt.f32 %v3611_v45  ;;  %v1268_v25 = vsel %vm1266_vm2, %v1267_v9, %v1265_v35  ;;  %v1277_v10 = vmul.f32 %v2372_v26, %v3538_v21  ;;  %vm1273_vm6 = vcmp.eq.f32.partialorder %v3574_v22, 0.0 }
 0x174   : > { %2395 = vpow2.f32 %v1612_v4  ;;  %vm1285_vm7 = vcmp.eq.f32.partialorder %v3588_v0, inf  ;;  %v2374_v23 = vpop.eup %2373  ;;  %1893 = vst [vmem:[%s3266_s24 + $0xb8] sm:$0xff] %v1829_v61  ;;  %v1518_v50 = vsub.f32 0.0, %v1268_v25  ;;  %vm1287_vm8 = vcmp.eq.f32.partialorder %v3588_v0, 0.0 }
 0x175   : > { %v3635_v43 = vmax.f32 %v947_v49, 0.0  ;;  %v885_v11 = vmul.f32 2.0, %v648_v48  ;;  %v3637_v39 = vpop.eup %2375  ;;  %v1830_v24 = vmul.f32 %v2374_v23, %v3563_v8  ;;  %v1279_v53 = vsel %vm1278_vm3, %v3538_v21, %v1277_v10 }
 0x176   : > { %v1288_v62 = vand.u32 2147483648, %v3588_v0  ;;  %v886_v20 = vmul.f32 2.0, %v539_v30  ;;  %v3644_v41 = vpop.eup %2377  ;;  %v1706_v42 = vadd.f32 1.0, %v3637_v39  ;;  %v1614_v60 = vmul.f32 1.442695, %v1518_v50 }
 0x177   : > { %v1282_v15 = vsel %vm1280_vm4, %v1281_v31, %v1279_v53  ;;  %2397 = vrsqrt.f32 %v3635_v43  ;;  %v2380_v32 = vpop.eup %2379  ;;  %1894 = vst [vmem:[%s3266_s24 + $0xc0] sm:$0xff] %v1830_v24  ;;  %v1708_v8 = vadd.f32 1.0, %v3644_v41  ;;  %vm1292_vm9 = vcmp.eq.f32.partialorder %v3609_v38, inf }
 0x178   : > { %v1520_v63 = vsub.f32 0.0, %v1282_v15  ;;  %v822_v28 = vadd.f32 %v2877_v54, %v3108_v58  ;;  %v2382_v12 = vpop.eup %2381  ;;  %v1832_v46 = vmul.f32 %v2380_v32, %v3577_v37  ;;  %2399 = vrcp.f32 %v1706_v42  ;;  %v654_v42 = vpop.f32.mrf.mxu1 }
 0x179   : > { %vm1294_vm10 = vcmp.eq.f32.partialorder %v3609_v38, 0.0  ;;  %v949_v21 = vsub.f32 %v3568_v44, %v885_v11  ;;  %v2384_v52 = vpop.eup %2383  ;;  %2401 = vrcp.f32 %v1708_v8  ;;  %v1270_v18 = vmul.f32 %v2382_v12, %v3574_v22  ;;  %v541_v11 = vpop.f32.mrf.mxu0 }
 0x17a   : > { %v1618_v17 = vmul.f32 1.442695, %v1520_v63  ;;  %v950_v6 = vsub.f32 %v822_v28, %v886_v20  ;;  %1896 = vst [vmem:[%s3266_s24 + $0xd0] sm:$0xff] %v1832_v46  ;;  %2403 = vpow2.f32 %v1614_v60  ;;  %v1284_v36 = vmul.f32 %v2384_v52, %v3588_v0 }
 0x17b   : > { %v1295_v59 = vand.u32 2147483648, %v3609_v38  ;;  %v3662_v5 = vmax.f32 %v949_v21, 0.0  ;;  %v3664_v37 = vpop.eup %2385  ;;  %v1272_v44 = vsel %vm1271_vm5, %v3574_v22, %v1270_v18  ;;  %vm1306_vm11 = vcmp.eq.f32.partialorder %v3611_v45, inf }
 0x17c   : > { %2405 = vpow2.f32 %v1618_v17  ;;  %v3670_v27 = vmax.f32 %v950_v6, 0.0  ;;  %v2388_v13 = vpop.eup %2387  ;;  %v1707_v3 = vadd.f32 1.0, %v3664_v37  ;;  %v1275_v34 = vsel %vm1273_vm6, %v1274_v16, %v1272_v44 }
 0x17d   : > { %v1286_v9 = vsel %vm1285_vm7, %v3588_v0, %v1284_v36  ;;  %2407 = vrsqrt.f32 %v3662_v5  ;;  %v2390_v49 = vpop.eup %2389  ;;  %v1831_v19 = vmul.f32 %v2388_v13, %v3594_v47  ;;  %v1519_v4 = vsub.f32 0.0, %v1275_v34  ;;  %v543_v34 = vpop.f32.mrf.mxu0 }
 0x17e   : > { %v1289_v31 = vsel %vm1287_vm8, %v1288_v62, %v1286_v9  ;;  %vm1308_vm12 = vcmp.eq.f32.partialorder %v3611_v45, 0.0  ;;  %v2392_v48 = vpop.eup %2391  ;;  %2409 = vrcp.f32 %v1707_v3  ;;  %v1291_v26 = vmul.f32 %v2390_v49, %v3609_v38 }
 0x17f   : > { %v1521_v22 = vsub.f32 0.0, %v1289_v31  ;;  %v1309_v61 = vand.u32 2147483648, %v3611_v45  ;;  %1895 = vst [vmem:[%s3266_s24 + $0xc8] sm:$0xff] %v1831_v19  ;;  %v1833_v16 = vmul.f32 %v2392_v48, %v3604_v2  ;;  %v1616_v30 = vmul.f32 1.442695, %v1519_v4 }
 0x180   : > { %v2394_v35 = vpop.eup %2393  ;;  %2411 = vrsqrt.f32 %v3670_v27  ;;  %v888_v47 = vmul.f32 2.0, %v652_v40  ;;  %v1293_v10 = vsel %vm1292_vm9, %v3609_v38, %v1291_v26  ;;  %v824_v50 = vadd.f32 %v2879_v55, %v3108_v58 }
 0x181   : > { %v3688_v0 = vpop.eup %2395  ;;  %v1620_v25 = vmul.f32 1.442695, %v1521_v22  ;;  %v1305_v23 = vmul.f32 %v2394_v35, %v3611_v45  ;;  %1897 = vst [vmem:[%s3266_s24 + $0xd8] sm:$0xff] %v1833_v16  ;;  %2413 = vpow2.f32 %v1616_v30  ;;  %v1296_v24 = vsel %vm1294_vm10, %v1295_v59, %v1293_v10 }
 0x182   : > { %v1709_v2 = vadd.f32 1.0, %v3688_v0  ;;  %vm1299_vm13 = vcmp.eq.f32.partialorder %v3635_v43, inf  ;;  %v1522_v53 = vsub.f32 0.0, %v1296_v24  ;;  %v823_v20 = vadd.f32 %v2881_v56, %v3108_v58 }
 0x183   : > { %2415 = vpow2.f32 %v1620_v25  ;;  %v1307_v62 = vsel %vm1306_vm11, %v3611_v45, %v1305_v23  ;;  %v952_v32 = vsub.f32 %v824_v50, %v888_v47  ;;  %v887_v38 = vmul.f32 2.0, %v541_v11 }
 0x184   : > { %v2398_v60 = vpop.eup %2397  ;;  %2417 = vrcp.f32 %v1709_v2  ;;  %v1310_v15 = vsel %vm1308_vm12, %v1309_v61, %v1307_v62  ;;  %v1622_v8 = vmul.f32 1.442695, %v1522_v53  ;;  %vm1301_vm14 = vcmp.eq.f32.partialorder %v3635_v43, 0.0 }
 0x185   : > { %v1524_v63 = vsub.f32 0.0, %v1310_v15  ;;  %v1298_v28 = vmul.f32 %v2398_v60, %v3635_v43  ;;  %v2400_v12 = vpop.eup %2399  ;;  %v1302_v46 = vand.u32 2147483648, %v3635_v43  ;;  %v3711_v21 = vmax.f32 %v952_v32, 0.0  ;;  %v545_v15 = vpop.f32.mrf.mxu0 }
 0x186   : > { %v951_v52 = vsub.f32 %v823_v20, %v887_v38  ;;  %v889_v17 = vmul.f32 2.0, %v654_v42  ;;  %v2402_v18 = vpop.eup %2401  ;;  %v1834_v45 = vmul.f32 %v2400_v12, %v3637_v39  ;;  %2419 = vpow2.f32 %v1622_v8 }
 0x187   : > { %v1626_v6 = vmul.f32 1.442695, %v1524_v63  ;;  %v1300_v36 = vsel %vm1299_vm13, %v3635_v43, %v1298_v28  ;;  %v3717_v59 = vpop.eup %2403  ;;  %v1836_v44 = vmul.f32 %v2402_v18, %v3644_v41  ;;  %2421 = vrsqrt.f32 %v3711_v21 }
 0x188   : > { %v1303_v13 = vsel %vm1301_vm14, %v1302_v46, %v1300_v36  ;;  %v825_v3 = vadd.f32 %v2883_v57, %v3108_v58  ;;  %1898 = vst [vmem:[%s3266_s24 + $0xe0] sm:$0xff] %v1834_v45  ;;  %v1710_v39 = vadd.f32 1.0, %v3717_v59  ;;  %v3729_v40 = vadd.f32 %v2883_v57, %v3167_v51 }
 0x189   : > { %v3723_v9 = vpop.eup %2405  ;;  %2423 = vpow2.f32 %v1626_v6  ;;  %v1523_v43 = vsub.f32 0.0, %v1303_v13  ;;  %1900 = vst [vmem:[%s3266_s24 + $0xf0] sm:$0xff] %v1836_v44  ;;  %vm1313_vm15 = vcmp.eq.f32.partialorder %v3662_v5, inf  ;;  %v3734_v19 = vmax.f32 %v951_v52, 0.0 }
 0x18a   : > { %v2408_v49 = vpop.eup %2407  ;;  %v1712_v41 = vadd.f32 1.0, %v3723_v9  ;;  %v953_v58 = vsub.f32 %v825_v3, %v889_v17  ;;  %2425 = vrcp.f32 %v1710_v39  ;;  %v890_v48 = vmul.f32 2.0, %v543_v34  ;;  %v549_v34 = vpop.f32.mrf.mxu0 }
 0x18b   : > { %v1624_v4 = vmul.f32 1.442695, %v1523_v43  ;;  %v1312_v31 = vmul.f32 %v2408_v49, %v3662_v5  ;;  %v2410_v22 = vpop.eup %2409  ;;  %vm1315_vm0 = vcmp.eq.f32.partialorder %v3662_v5, 0.0  ;;  %v1316_v51 = vand.u32 2147483648, %v3662_v5 }
 0x18c   : > { %2427 = vrcp.f32 %v1712_v41  ;;  %v826_v26 = vadd.f32 %v2877_v54, %v2892_v1  ;;  %v1835_v35 = vmul.f32 %v2410_v22, %v3664_v37  ;;  %v3743_v30 = vmax.f32 %v953_v58, 0.0  ;;  %v656_v37 = vpop.f32.mrf.mxu1 }
 0x18d   : > { %v2412_v61 = vpop.eup %2411  ;;  %2429 = vpow2.f32 %v1624_v4  ;;  %v1314_v16 = vsel %vm1313_vm15, %v3662_v5, %v1312_v31  ;;  %vm1320_vm1 = vcmp.eq.f32.partialorder %v3670_v27, inf  ;;  %v1323_v11 = vand.u32 2147483648, %v3670_v27 }
 0x18e   : > { %v1317_v47 = vsel %vm1315_vm0, %v1316_v51, %v1314_v16  ;;  %v1319_v25 = vmul.f32 %v2412_v61, %v3670_v27  ;;  %2431 = vrsqrt.f32 %v3734_v19  ;;  %v954_v10 = vsub.f32 %v826_v26, %v890_v48  ;;  %v3747_v23 = vpop.eup %2413  ;;  %1899 = vst [vmem:[%s3266_s24 + $0xe8] sm:$0xff] %v1835_v35  ;;  %v658_v28 = vpop.f32.mrf.mxu1 }
 0x18f   : > { %v1525_v50 = vsub.f32 0.0, %v1317_v47  ;;  %2433 = vrsqrt.f32 %v3743_v30  ;;  %v1711_v2 = vadd.f32 1.0, %v3747_v23  ;;  %vm1322_vm2 = vcmp.eq.f32.partialorder %v3670_v27, 0.0 }
 0x190   : > { %v3753_v5 = vpop.eup %2415  ;;  %v1321_v24 = vsel %vm1320_vm1, %v3670_v27, %v1319_v25  ;;  %vm1334_vm3 = vcmp.eq.f32.partialorder %v3711_v21, inf  ;;  %v3760_v60 = vmax.f32 %v954_v10, 0.0  ;;  %vm1336_vm4 = vcmp.eq.f32.partialorder %v3711_v21, 0.0 }
 0x191   : > { %v2418_v53 = vpop.eup %2417  ;;  %v1713_v62 = vadd.f32 1.0, %v3753_v5  ;;  %v1628_v20 = vmul.f32 1.442695, %v1525_v50  ;;  %v1324_v42 = vsel %vm1322_vm2, %v1323_v11, %v1321_v24  ;;  %2435 = vrcp.f32 %v1711_v2 }
 0x192   : > { %v1837_v32 = vmul.f32 %v2418_v53, %v3688_v0  ;;  %v1526_v38 = vsub.f32 0.0, %v1324_v42  ;;  %v1337_v27 = vand.u32 2147483648, %v3711_v21  ;;  %v828_v8 = vadd.f32 %v2879_v55, %v2892_v1 }
 0x193   : > { %2437 = vrcp.f32 %v1713_v62  ;;  %v892_v63 = vmul.f32 2.0, %v656_v37  ;;  %v3767_v12 = vpop.eup %2419  ;;  %v827_v0 = vadd.f32 %v2881_v56, %v2892_v1  ;;  %v891_v52 = vmul.f32 2.0, %v545_v15 }
 0x194   : > { %1901 = vst [vmem:[%s3266_s24 + $0xf8] sm:$0xff] %v1837_v32  ;;  %2439 = vpow2.f32 %v1628_v20  ;;  %v1630_v46 = vmul.f32 1.442695, %v1526_v38  ;;  %v2422_v17 = vpop.eup %2421  ;;  %v1714_v18 = vadd.f32 1.0, %v3767_v12  ;;  %vm1327_vm5 = vcmp.eq.f32.partialorder %v3734_v19, inf }
 0x195   : > { %2441 = vrsqrt.f32 %v3760_v60  ;;  %v956_v45 = vsub.f32 %v828_v8, %v892_v63  ;;  %v829_v6 = vadd.f32 %v2883_v57, %v2892_v1  ;;  %v1333_v44 = vmul.f32 %v2422_v17, %v3711_v21 }
 0x196   : > { %v3777_v36 = vpop.eup %2423  ;;  %2443 = vpow2.f32 %v1630_v46  ;;  %v955_v13 = vsub.f32 %v827_v0, %v891_v52  ;;  %v893_v3 = vmul.f32 2.0, %v658_v28  ;;  %vm1329_vm6 = vcmp.eq.f32.partialorder %v3734_v19, 0.0 }
 0x197   : > { %2445 = vrcp.f32 %v1714_v18  ;;  %v1716_v39 = vadd.f32 1.0, %v3777_v36  ;;  %v3782_v43 = vmax.f32 %v956_v45, 0.0  ;;  %v2426_v49 = vpop.eup %2425  ;;  %v1335_v1 = vsel %vm1334_vm3, %v3711_v21, %v1333_v44  ;;  %v551_v44 = vpop.f32.mrf.mxu0 }
 0x198   : > { %v1330_v41 = vand.u32 2147483648, %v3734_v19  ;;  %v3788_v58 = vmax.f32 %v955_v13, 0.0  ;;  %v957_v4 = vsub.f32 %v829_v6, %v893_v3  ;;  %v1838_v48 = vmul.f32 %v2426_v49, %v3717_v59  ;;  %v662_v59 = vpop.f32.mrf.mxu1 }
 0x199   : > { %v2428_v31 = vpop.eup %2427  ;;  %2447 = vrcp.f32 %v1716_v39  ;;  %v1338_v22 = vsel %vm1336_vm4, %v1337_v27, %v1335_v1  ;;  %v894_v51 = vmul.f32 2.0, %v549_v34  ;;  %vm1341_vm7 = vcmp.eq.f32.partialorder %v3743_v30, inf }
 0x19a   : > { %v3793_v26 = vpop.eup %2429  ;;  %v1840_v61 = vmul.f32 %v2428_v31, %v3723_v9  ;;  %v1528_v35 = vsub.f32 0.0, %v1338_v22  ;;  %2449 = vrsqrt.f32 %v3782_v43  ;;  %1902 = vst [vmem:[%s3266_s24 + $0x100] sm:$0xff] %v1838_v48  ;;  %vm1343_vm8 = vcmp.eq.f32.partialorder %v3743_v30, 0.0  ;;  %v664_v48 = vpop.f32.mrf.mxu1 }
 0x19b   : > { %v2432_v16 = vpop.eup %2431  ;;  %v1715_v47 = vadd.f32 1.0, %v3793_v26  ;;  %2451 = vrsqrt.f32 %v3788_v58  ;;  %v830_v21 = vadd.f32 %v2877_v54, %v3140_v7  ;;  %v1344_v50 = vand.u32 2147483648, %v3743_v30 }
 0x19c   : > { %v2434_v25 = vpop.eup %2433  ;;  %1904 = vst [vmem:[%s3266_s24 + $0x110] sm:$0xff] %v1840_v61  ;;  %v1634_v9 = vmul.f32 1.442695, %v1528_v35  ;;  %v1326_v10 = vmul.f32 %v2432_v16, %v3734_v19  ;;  %vm1348_vm9 = vcmp.eq.f32.partialorder %v3760_v60, inf  ;;  %v3809_v37 = vmax.f32 %v957_v4, 0.0  ;;  %v553_v35 = vpop.f32.mrf.mxu0 }
 0x19d   : > { %2453 = vrcp.f32 %v1715_v47  ;;  %v1340_v11 = vmul.f32 %v2434_v25, %v3743_v30  ;;  %v958_v2 = vsub.f32 %v830_v21, %v894_v51  ;;  %vm1350_vm10 = vcmp.eq.f32.partialorder %v3760_v60, 0.0 }
 0x19e   : > { %2455 = vpow2.f32 %v1634_v9  ;;  %v1328_v24 = vsel %vm1327_vm5, %v3734_v19, %v1326_v10  ;;  %v896_v53 = vmul.f32 2.0, %v662_v59  ;;  %v2436_v62 = vpop.eup %2435  ;;  %v1351_v15 = vand.u32 2147483648, %v3760_v60 }
 0x19f   : > { %v1331_v20 = vsel %vm1329_vm6, %v1330_v41, %v1328_v24  ;;  %v1342_v42 = vsel %vm1341_vm7, %v3743_v30, %v1340_v11  ;;  %2457 = vrsqrt.f32 %v3809_v37  ;;  %v1839_v38 = vmul.f32 %v2436_v62, %v3747_v23 }
 0x1a0   : > { %v2438_v32 = vpop.eup %2437  ;;  %v1527_v27 = vsub.f32 0.0, %v1331_v20  ;;  %v1345_v8 = vsel %vm1343_vm8, %v1344_v50, %v1342_v42  ;;  %v832_v19 = vadd.f32 %v2879_v55, %v3140_v7  ;;  %vm1362_vm11 = vcmp.eq.f32.partialorder %v3782_v43, inf }
 0x1a1   : > { %v3827_v63 = vpop.eup %2439  ;;  %v1841_v28 = vmul.f32 %v2438_v32, %v3753_v5  ;;  %v1529_v46 = vsub.f32 0.0, %v1345_v8  ;;  %v3831_v0 = vmax.f32 %v958_v2, 0.0  ;;  %1903 = vst [vmem:[%s3266_s24 + $0x108] sm:$0xff] %v1839_v38  ;;  %vm1364_vm12 = vcmp.eq.f32.partialorder %v3782_v43, 0.0 }
 0x1a2   : > { %v2442_v52 = vpop.eup %2441  ;;  %v1717_v23 = vadd.f32 1.0, %v3827_v63  ;;  %v1632_v17 = vmul.f32 1.442695, %v1527_v27  ;;  %v960_v30 = vsub.f32 %v832_v19, %v896_v53  ;;  %v1365_v5 = vand.u32 2147483648, %v3782_v43 }
 0x1a3   : > { %v3836_v18 = vpop.eup %2443  ;;  %1905 = vst [vmem:[%s3266_s24 + $0x118] sm:$0xff] %v1841_v28  ;;  %v1636_v45 = vmul.f32 1.442695, %v1529_v46  ;;  %v1347_v6 = vmul.f32 %v2442_v52, %v3760_v60  ;;  %2459 = vrsqrt.f32 %v3831_v0  ;;  %vm1355_vm13 = vcmp.eq.f32.partialorder %v3788_v58, inf  ;;  %v666_v28 = vpop.f32.mrf.mxu1 }
 0x1a4   : > { %v2446_v13 = vpop.eup %2445  ;;  %2461 = vrcp.f32 %v1717_v23  ;;  %v1718_v3 = vadd.f32 1.0, %v3836_v18  ;;  %vm1357_vm14 = vcmp.eq.f32.partialorder %v3788_v58, 0.0  ;;  %v3849_v49 = vmax.f32 %v960_v30, 0.0 }
 0x1a5   : > { %v1842_v34 = vmul.f32 %v2446_v13, %v3767_v12  ;;  %2463 = vpow2.f32 %v1632_v17  ;;  %v1349_v39 = vsel %vm1348_vm9, %v3760_v60, %v1347_v6  ;;  %v1358_v4 = vand.u32 2147483648, %v3788_v58 }
 0x1a6   : > { %v2448_v1 = vpop.eup %2447  ;;  %2465 = vrcp.f32 %v1718_v3  ;;  %v1352_v41 = vsel %vm1350_vm10, %v1351_v15, %v1349_v39  ;;  %v895_v31 = vmul.f32 2.0, %v551_v44  ;;  %v831_v61 = vadd.f32 %v2881_v56, %v3140_v7 }
 0x1a7   : > { %v2450_v22 = vpop.eup %2449  ;;  %1906 = vst [vmem:[%s3266_s24 + $0x120] sm:$0xff] %v1842_v34  ;;  %v1844_v12 = vmul.f32 %v2448_v1, %v3777_v36  ;;  %2467 = vpow2.f32 %v1636_v45  ;;  %v1530_v51 = vsub.f32 0.0, %v1352_v41  ;;  %vm1369_vm15 = vcmp.eq.f32.partialorder %v3809_v37, inf }
 0x1a8   : > { %v2452_v16 = vpop.eup %2451  ;;  %v1361_v47 = vmul.f32 %v2450_v22, %v3782_v43  ;;  %vm1371_vm0 = vcmp.eq.f32.partialorder %v3809_v37, 0.0  ;;  %2469 = vrsqrt.f32 %v3849_v49  ;;  %v959_v36 = vsub.f32 %v831_v61, %v895_v31 }
 0x1a9   : > { %1908 = vst [vmem:[%s3266_s24 + $0x130] sm:$0xff] %v1844_v12  ;;  %v1638_v60 = vmul.f32 1.442695, %v1530_v51  ;;  %v1354_v21 = vmul.f32 %v2452_v16, %v3788_v58  ;;  %v897_v59 = vmul.f32 2.0, %v664_v48  ;;  %v833_v10 = vadd.f32 %v2883_v57, %v3140_v7  ;;  %v555_v48 = vpop.f32.mrf.mxu0 }
 0x1aa   : > { %v2454_v25 = vpop.eup %2453  ;;  %v1363_v9 = vsel %vm1362_vm11, %v3782_v43, %v1361_v47  ;;  %v834_v50 = vadd.f32 %v2877_v54, %v2938_v33  ;;  %v898_v11 = vmul.f32 2.0, %v553_v35  ;;  %v3882_v15 = vmax.f32 %v959_v36, 0.0  ;;  %v668_v35 = vpop.f32.mrf.mxu1 }
 0x1ab   : > { %v3871_v2 = vpop.eup %2455  ;;  %v1843_v24 = vmul.f32 %v2454_v25, %v3793_v26  ;;  %2471 = vpow2.f32 %v1638_v60  ;;  %v1366_v53 = vsel %vm1364_vm12, %v1365_v5, %v1363_v9  ;;  %v1356_v62 = vsel %vm1355_vm13, %v3788_v58, %v1354_v21 }
 0x1ac   : > { %v2458_v20 = vpop.eup %2457  ;;  %v1720_v42 = vadd.f32 1.0, %v3871_v2  ;;  %v1532_v7 = vsub.f32 0.0, %v1366_v53  ;;  %v1359_v54 = vsel %vm1357_vm14, %v1358_v4, %v1356_v62  ;;  %v961_v38 = vsub.f32 %v833_v10, %v897_v59 }
 0x1ad   : > { %1907 = vst [vmem:[%s3266_s24 + $0x128] sm:$0xff] %v1843_v24  ;;  %v1531_v32 = vsub.f32 0.0, %v1359_v54  ;;  %v1368_v26 = vmul.f32 %v2458_v20, %v3809_v37  ;;  %v962_v43 = vsub.f32 %v834_v50, %v898_v11  ;;  %v1372_v8 = vand.u32 2147483648, %v3809_v37  ;;  %v559_v50 = vpop.f32.mrf.mxu0  ;;  %v672_v11 = vpop.f32.mrf.mxu1 }
 0x1ae   : > { %2473 = vrcp.f32 %v1720_v42  ;;  %v1642_v27 = vmul.f32 1.442695, %v1532_v7  ;;  %vm1376_vm1 = vcmp.eq.f32.partialorder %v3831_v0, inf  ;;  %vm1378_vm2 = vcmp.eq.f32.partialorder %v3831_v0, 0.0 }
 0x1af   : > { %v1640_v19 = vmul.f32 1.442695, %v1531_v32  ;;  %v1370_v58 = vsel %vm1369_vm15, %v3809_v37, %v1368_v26  ;;  %2475 = vrsqrt.f32 %v3882_v15  ;;  %v3895_v23 = vmax.f32 %v961_v38, 0.0 }
 0x1b0   : > { %v2460_v46 = vpop.eup %2459  ;;  %2477 = vpow2.f32 %v1642_v27  ;;  %v1373_v52 = vsel %vm1371_vm0, %v1372_v8, %v1370_v58  ;;  %v3897_v17 = vmax.f32 %v962_v43, 0.0  ;;  %v1379_v5 = vand.u32 2147483648, %v3831_v0 }
 0x1b1   : > { %v2462_v30 = vpop.eup %2461  ;;  %2479 = vpow2.f32 %v1640_v19  ;;  %v1533_v45 = vsub.f32 0.0, %v1373_v52  ;;  %v1375_v6 = vmul.f32 %v2460_v46, %v3831_v0  ;;  %vm1390_vm3 = vcmp.eq.f32.partialorder %v3849_v49, inf }
 0x1b2   : > { %v3901_v44 = vpop.eup %2463  ;;  %v1845_v13 = vmul.f32 %v2462_v30, %v3827_v63  ;;  %2481 = vrsqrt.f32 %v3895_v23  ;;  %v900_v37 = vmul.f32 2.0, %v666_v28  ;;  %vm1392_vm4 = vcmp.eq.f32.partialorder %v3849_v49, 0.0 }
 0x1b3   : > { %v2466_v3 = vpop.eup %2465  ;;  %v1719_v34 = vadd.f32 1.0, %v3901_v44  ;;  %v1644_v39 = vmul.f32 1.442695, %v1533_v45  ;;  %v1377_v1 = vsel %vm1376_vm1, %v3831_v0, %v1375_v6  ;;  %2483 = vrsqrt.f32 %v3897_v17 }
 0x1b4   : > { %v3911_v41 = vpop.eup %2467  ;;  %1909 = vst [vmem:[%s3266_s24 + $0x138] sm:$0xff] %v1845_v13  ;;  %v1846_v63 = vmul.f32 %v2466_v3, %v3836_v18  ;;  %v1380_v4 = vsel %vm1378_vm2, %v1379_v5, %v1377_v1  ;;  %v836_v31 = vadd.f32 %v2879_v55, %v2938_v33  ;;  %v1393_v61 = vand.u32 2147483648, %v3849_v49 }
 0x1b5   : > { %v2470_v22 = vpop.eup %2469  ;;  %2485 = vrcp.f32 %v1719_v34  ;;  %v1721_v12 = vadd.f32 1.0, %v3911_v41  ;;  %v1534_v51 = vsub.f32 0.0, %v1380_v4  ;;  %vm1383_vm5 = vcmp.eq.f32.partialorder %v3882_v15, inf }
 0x1b6   : > { %1910 = vst [vmem:[%s3266_s24 + $0x140] sm:$0xff] %v1846_v63  ;;  %2487 = vpow2.f32 %v1644_v39  ;;  %v1389_v18 = vmul.f32 %v2470_v22, %v3849_v49  ;;  %v964_v0 = vsub.f32 %v836_v31, %v900_v37  ;;  %v835_v55 = vadd.f32 %v2881_v56, %v2938_v33 }
 0x1b7   : > { %2489 = vrcp.f32 %v1721_v12  ;;  %v1646_v16 = vmul.f32 1.442695, %v1534_v51  ;;  %v899_v47 = vmul.f32 2.0, %v555_v48  ;;  %v837_v59 = vadd.f32 %v2883_v57, %v2938_v33  ;;  %v561_v12 = vpop.f32.mrf.mxu0 }
 0x1b8   : > { %v3927_v60 = vpop.eup %2471  ;;  %v1391_v21 = vsel %vm1390_vm3, %v3849_v49, %v1389_v18  ;;  %v3932_v36 = vmax.f32 %v964_v0, 0.0  ;;  %v901_v25 = vmul.f32 2.0, %v668_v35  ;;  %vm1385_vm6 = vcmp.eq.f32.partialorder %v3882_v15, 0.0  ;;  %v674_v0 = vpop.f32.mrf.mxu1 }
 0x1b9   : > { %v1722_v9 = vadd.f32 1.0, %v3927_v60  ;;  %2491 = vpow2.f32 %v1646_v16  ;;  %v1394_v10 = vsel %vm1392_vm4, %v1393_v61, %v1391_v21  ;;  %v963_v56 = vsub.f32 %v835_v55, %v899_v47 }
 0x1ba   : > { %v1536_v24 = vsub.f32 0.0, %v1394_v10  ;;  %v1386_v53 = vand.u32 2147483648, %v3882_v15  ;;  %2493 = vrsqrt.f32 %v3932_v36  ;;  %vm1397_vm7 = vcmp.eq.f32.partialorder %v3895_v23, inf }
 0x1bb   : > { %v2474_v62 = vpop.eup %2473  ;;  %2495 = vrcp.f32 %v1722_v9  ;;  %v3943_v33 = vmax.f32 %v963_v56, 0.0  ;;  %v965_v20 = vsub.f32 %v837_v59, %v901_v25  ;;  %v902_v54 = vmul.f32 2.0, %v559_v50  ;;  %v563_v59 = vpop.f32.mrf.mxu0 }
 0x1bc   : > { %v2476_v49 = vpop.eup %2475  ;;  %v1848_v42 = vmul.f32 %v2474_v62, %v3871_v2  ;;  %v1650_v7 = vmul.f32 1.442695, %v1536_v24  ;;  %v904_v32 = vmul.f32 2.0, %v672_v11  ;;  %vm1399_vm8 = vcmp.eq.f32.partialorder %v3895_v23, 0.0  ;;  %v676_v24 = vpop.f32.mrf.mxu1 }
 0x1bd   : > { %v3946_v26 = vpop.eup %2477  ;;  %v1382_v38 = vmul.f32 %v2476_v49, %v3882_v15  ;;  %v1400_v43 = vand.u32 2147483648, %v3895_v23  ;;  %2497 = vrsqrt.f32 %v3943_v33  ;;  %vm1404_vm9 = vcmp.eq.f32.partialorder %v3897_v17, inf }
 0x1be   : > { %v3952_v27 = vpop.eup %2479  ;;  %1912 = vst [vmem:[%s3266_s24 + $0x150] sm:$0xff] %v1848_v42  ;;  %v1724_v8 = vadd.f32 1.0, %v3946_v26  ;;  %2499 = vpow2.f32 %v1650_v7  ;;  %v3957_v2 = vmax.f32 %v965_v20, 0.0  ;;  %v966_v46 = vsub.f32 %v3182_v29, %v902_v54  ;;  %v4220_v20 = vld [vmem:[#allocation9_spill] sm:$0xff] }
 0x1bf   : > { %v2482_v19 = vpop.eup %2481  ;;  %v1723_v58 = vadd.f32 1.0, %v3952_v27  ;;  %v1384_v28 = vsel %vm1383_vm5, %v3882_v15, %v1382_v38  ;;  %v968_v52 = vsub.f32 %v3221_v14, %v904_v32  ;;  %vm1406_vm10 = vcmp.eq.f32.partialorder %v3897_v17, 0.0 }
 0x1c0   : > { %2501 = vrcp.f32 %v1724_v8  ;;  %v1387_v30 = vsel %vm1385_vm6, %v1386_v53, %v1384_v28  ;;  %v1396_v45 = vmul.f32 %v2482_v19, %v3895_v23  ;;  %v2484_v6 = vpop.eup %2483  ;;  %v1407_v13 = vand.u32 2147483648, %v3897_v17 }
 0x1c1   : > { %2503 = vrcp.f32 %v1723_v58  ;;  %v1535_v5 = vsub.f32 0.0, %v1387_v30  ;;  %vm1418_vm11 = vcmp.eq.f32.partialorder %v3932_v36, inf  ;;  %v1403_v14 = vmul.f32 %v2484_v6, %v3897_v17  ;;  %v4221_v6 = vld [vmem:[#allocation6_spill] sm:$0xff] }
 0x1c2   : > { %v2486_v37 = vpop.eup %2485  ;;  %v1398_v29 = vsel %vm1397_vm7, %v3895_v23, %v1396_v45  ;;  %2505 = vrsqrt.f32 %v3957_v2  ;;  %v3976_v15 = vmax.f32 %v966_v46, 0.0  ;;  %v3983_v63 = vmax.f32 %v968_v52, 0.0 }
 0x1c3   : > { %v3978_v3 = vpop.eup %2487  ;;  %v1847_v34 = vmul.f32 %v2486_v37, %v3901_v44  ;;  %v1648_v39 = vmul.f32 1.442695, %v1535_v5  ;;  %v1401_v1 = vsel %vm1399_vm8, %v1400_v43, %v1398_v29  ;;  %v1405_v22 = vsel %vm1404_vm9, %v3897_v17, %v1403_v14  ;;  %v4222_v29 = vld [vmem:[#allocation8_spill] sm:$0xff] }
 0x1c4   : > { %v2490_v4 = vpop.eup %2489  ;;  %v1725_v31 = vadd.f32 1.0, %v3978_v3  ;;  %v1537_v48 = vsub.f32 0.0, %v1401_v1  ;;  %2507 = vrsqrt.f32 %v3976_v15  ;;  %v1408_v23 = vsel %vm1406_vm10, %v1407_v13, %v1405_v22  ;;  %v565_v13 = vpop.f32.mrf.mxu0 }
 0x1c5   : > { %1911 = vst [vmem:[%s3266_s24 + $0x148] sm:$0xff] %v1847_v34  ;;  %v1849_v44 = vmul.f32 %v2490_v4, %v3911_v41  ;;  %2509 = vpow2.f32 %v1648_v39  ;;  %vm1420_vm12 = vcmp.eq.f32.partialorder %v3932_v36, 0.0  ;;  %v1538_v35 = vsub.f32 0.0, %v1408_v23 }
 0x1c6   : > { %v3995_v51 = vpop.eup %2491  ;;  %2511 = vrcp.f32 %v1725_v31  ;;  %v1652_v61 = vmul.f32 1.442695, %v1537_v48  ;;  %v1421_v18 = vand.u32 2147483648, %v3932_v36  ;;  %vm1411_vm13 = vcmp.eq.f32.partialorder %v3943_v33, inf }
 0x1c7   : > { %v2494_v16 = vpop.eup %2493  ;;  %1913 = vst [vmem:[%s3266_s24 + $0x158] sm:$0xff] %v1849_v44  ;;  %v1726_v55 = vadd.f32 1.0, %v3995_v51  ;;  %vm1413_vm14 = vcmp.eq.f32.partialorder %v3943_v33, 0.0  ;;  %2513 = vrsqrt.f32 %v3983_v63  ;;  %v1654_v41 = vmul.f32 1.442695, %v1538_v35 }
 0x1c8   : > { %v2496_v17 = vpop.eup %2495  ;;  %2515 = vpow2.f32 %v1652_v61  ;;  %v1417_v47 = vmul.f32 %v2494_v16, %v3932_v36  ;;  %v1414_v21 = vand.u32 2147483648, %v3943_v33  ;;  %vm1425_vm15 = vcmp.eq.f32.partialorder %v3957_v2, inf }
 0x1c9   : > { %v1850_v25 = vmul.f32 %v2496_v17, %v3927_v60  ;;  %2517 = vrcp.f32 %v1726_v55  ;;  %v903_v9 = vmul.f32 2.0, %v561_v12  ;;  %vm1427_vm0 = vcmp.eq.f32.partialorder %v3957_v2, 0.0 }
 0x1ca   : > { %v2498_v10 = vpop.eup %2497  ;;  %2519 = vpow2.f32 %v1654_v41  ;;  %v1419_v56 = vsel %vm1418_vm11, %v3932_v36, %v1417_v47  ;;  %v1428_v50 = vand.u32 2147483648, %v3957_v2  ;;  %v905_v11 = vmul.f32 2.0, %v674_v0  ;;  %v678_v0 = vpop.f32.mrf.mxu1 }
 0x1cb   : > { %v4012_v53 = vpop.eup %2499  ;;  %1914 = vst [vmem:[%s3266_s24 + $0x160] sm:$0xff] %v1850_v25  ;;  %v1422_v60 = vsel %vm1420_vm12, %v1421_v18, %v1419_v56  ;;  %v1410_v62 = vmul.f32 %v2498_v10, %v3943_v33  ;;  %v967_v49 = vsub.f32 %v4220_v20, %v903_v9  ;;  %v906_v42 = vmul.f32 2.0, %v563_v59  ;;  %v4223_v59 = vld [vmem:[#allocation7_spill] sm:$0xff] }
 0x1cc   : > { %v1728_v7 = vadd.f32 1.0, %v4012_v53  ;;  %v1540_v54 = vsub.f32 0.0, %v1422_v60  ;;  %vm1432_vm1 = vcmp.eq.f32.partialorder %v3976_v15, inf  ;;  %vm1434_vm2 = vcmp.eq.f32.partialorder %v3976_v15, 0.0  ;;  %v4224_v60 = vld [vmem:[#allocation5_spill] sm:$0xff] }
 0x1cd   : > { %v2502_v32 = vpop.eup %2501  ;;  %v1412_v38 = vsel %vm1411_vm13, %v3943_v33, %v1410_v62  ;;  %v4025_v36 = vmax.f32 %v967_v49, 0.0  ;;  %v969_v43 = vsub.f32 %v3729_v40, %v905_v11  ;;  %v908_v8 = vmul.f32 2.0, %v676_v24 }
 0x1ce   : > { %v2504_v19 = vpop.eup %2503  ;;  %v1852_v58 = vmul.f32 %v2502_v32, %v3946_v26  ;;  %2521 = vrcp.f32 %v1728_v7  ;;  %v1658_v28 = vmul.f32 1.442695, %v1540_v54  ;;  %v1415_v46 = vsel %vm1413_vm14, %v1414_v21, %v1412_v38 }
 0x1cf   : > { %v2506_v52 = vpop.eup %2505  ;;  %v1851_v30 = vmul.f32 %v2504_v19, %v3952_v27  ;;  %v1539_v45 = vsub.f32 0.0, %v1415_v46  ;;  %2523 = vrsqrt.f32 %v4025_v36  ;;  %v970_v5 = vsub.f32 %v4221_v6, %v906_v42 }
 0x1d0   : > { %1916 = vst [vmem:[%s3266_s24 + $0x170] sm:$0xff] %v1852_v58  ;;  %2525 = vpow2.f32 %v1658_v28  ;;  %v1424_v40 = vmul.f32 %v2506_v52, %v3957_v2  ;;  %v1435_v26 = vand.u32 2147483648, %v3976_v15  ;;  %vm1446_vm3 = vcmp.eq.f32.partialorder %v3983_v63, inf }
 0x1d1   : > { %v2508_v37 = vpop.eup %2507  ;;  %1915 = vst [vmem:[%s3266_s24 + $0x168] sm:$0xff] %v1851_v30  ;;  %v1656_v33 = vmul.f32 1.442695, %v1539_v45  ;;  %vm1448_vm4 = vcmp.eq.f32.partialorder %v3983_v63, 0.0  ;;  %v4040_v27 = vmax.f32 %v969_v43, 0.0  ;;  %v972_v14 = vsub.f32 %v4222_v29, %v908_v8 }
 0x1d2   : > { %v4043_v34 = vpop.eup %2509  ;;  %v1426_v39 = vsel %vm1425_vm15, %v3957_v2, %v1424_v40  ;;  %v1431_v1 = vmul.f32 %v2508_v37, %v3976_v15  ;;  %v1449_v4 = vand.u32 2147483648, %v3983_v63  ;;  %v907_v31 = vmul.f32 2.0, %v565_v13 }
 0x1d3   : > { %v2512_v48 = vpop.eup %2511  ;;  %v1727_v22 = vadd.f32 1.0, %v4043_v34  ;;  %2527 = vpow2.f32 %v1656_v33  ;;  %v1429_v12 = vsel %vm1427_vm0, %v1428_v50, %v1426_v39  ;;  %v4053_v44 = vmax.f32 %v970_v5, 0.0 }
 0x1d4   : > { %v2514_v23 = vpop.eup %2513  ;;  %v1853_v61 = vmul.f32 %v2512_v48, %v3978_v3  ;;  %v1541_v35 = vsub.f32 0.0, %v1429_v12  ;;  %v1433_v18 = vsel %vm1432_vm1, %v3976_v15, %v1431_v1  ;;  %2529 = vrsqrt.f32 %v4040_v27 }
 0x1d5   : > { %v4060_v16 = vpop.eup %2515  ;;  %2531 = vrcp.f32 %v1727_v22  ;;  %v1436_v2 = vsel %vm1434_vm2, %v1435_v26, %v1433_v18  ;;  %v1445_v55 = vmul.f32 %v2514_v23, %v3983_v63  ;;  %v4065_v17 = vmax.f32 %v972_v14, 0.0 }
 0x1d6   : > { %v2518_v41 = vpop.eup %2517  ;;  %1917 = vst [vmem:[%s3266_s24 + $0x178] sm:$0xff] %v1853_v61  ;;  %v1729_v3 = vadd.f32 1.0, %v4060_v16  ;;  %v1660_v47 = vmul.f32 1.442695, %v1541_v35  ;;  %v1542_v21 = vsub.f32 0.0, %v1436_v2  ;;  %v971_v25 = vsub.f32 %v4223_v59, %v907_v31 }
 0x1d7   : > { %v4070_v9 = vpop.eup %2519  ;;  %v1854_v10 = vmul.f32 %v2518_v41, %v3995_v51  ;;  %v1447_v15 = vsel %vm1446_vm3, %v3983_v63, %v1445_v55  ;;  %2533 = vrsqrt.f32 %v4053_v44  ;;  %v909_v56 = vmul.f32 2.0, %v678_v0 }
 0x1d8   : > { %2535 = vrcp.f32 %v1729_v3  ;;  %v1730_v50 = vadd.f32 1.0, %v4070_v9  ;;  %v1662_v11 = vmul.f32 1.442695, %v1542_v21  ;;  %v1450_v24 = vsel %vm1448_vm4, %v1449_v4, %v1447_v15 }
 0x1d9   : > { %v845_v62 = vadd.f32 %v2883_v57, %v4224_v60  ;;  %1918 = vst [vmem:[%s3266_s24 + $0x180] sm:$0xff] %v1854_v10  ;;  %2537 = vpow2.f32 %v1660_v47  ;;  %v1544_v51 = vsub.f32 0.0, %v1450_v24  ;;  %v4083_v42 = vmax.f32 %v971_v25, 0.0 }
 0x1da   : > { %2539 = vrcp.f32 %v1730_v50  ;;  %vm1439_vm5 = vcmp.eq.f32.partialorder %v4025_v36, inf  ;;  %v1442_v43 = vand.u32 2147483648, %v4025_v36  ;;  %vm1441_vm6 = vcmp.eq.f32.partialorder %v4025_v36, 0.0 }
 0x1db   : > { %v2522_v20 = vpop.eup %2521  ;;  %2541 = vpow2.f32 %v1662_v11  ;;  %v1666_v49 = vmul.f32 1.442695, %v1544_v51  ;;  %v973_v7 = vsub.f32 %v845_v62, %v909_v56  ;;  %vm1453_vm7 = vcmp.eq.f32.partialorder %v4040_v27, inf }
 0x1dc   : > { %v2524_v54 = vpop.eup %2523  ;;  %v1856_v32 = vmul.f32 %v2522_v20, %v4012_v53  ;;  %2543 = vrsqrt.f32 %v4065_v17  ;;  %v1456_v5 = vand.u32 2147483648, %v4040_v27  ;;  %vm1455_vm8 = vcmp.eq.f32.partialorder %v4040_v27, 0.0 }
 0x1dd   : > { %v4087_v63 = vpop.eup %2525  ;;  %2545 = vpow2.f32 %v1666_v49  ;;  %v1438_v57 = vmul.f32 %v2524_v54, %v4025_v36  ;;  %v4095_v8 = vmax.f32 %v973_v7, 0.0  ;;  %vm1460_vm9 = vcmp.eq.f32.partialorder %v4053_v44, inf }
 0x1de   : > { %1920 = vst [vmem:[%s3266_s24 + $0x190] sm:$0xff] %v1856_v32  ;;  %v1732_v38 = vadd.f32 1.0, %v4087_v63  ;;  %2547 = vrsqrt.f32 %v4083_v42  ;;  %v1463_v39 = vand.u32 2147483648, %v4053_v44  ;;  %vm1462_vm10 = vcmp.eq.f32.partialorder %v4053_v44, 0.0 }
 0x1df   : > { %v1440_v53 = vsel %vm1439_vm5, %v4025_v36, %v1438_v57  ;;  %vm1474_vm11 = vcmp.eq.f32.partialorder %v4065_v17, inf  ;;  %v1477_v55 = vand.u32 2147483648, %v4065_v17  ;;  %vm1476_vm12 = vcmp.eq.f32.partialorder %v4065_v17, 0.0 }
 0x1e0   : > { %v4099_v19 = vpop.eup %2527  ;;  %2549 = vrcp.f32 %v1732_v38  ;;  %v1443_v58 = vsel %vm1441_vm6, %v1442_v43, %v1440_v53  ;;  %vm1467_vm13 = vcmp.eq.f32.partialorder %v4083_v42, inf  ;;  %vm1469_vm14 = vcmp.eq.f32.partialorder %v4083_v42, 0.0 }
 0x1e1   : > { %v2530_v28 = vpop.eup %2529  ;;  %v1731_v46 = vadd.f32 1.0, %v4099_v19  ;;  %v1543_v52 = vsub.f32 0.0, %v1443_v58  ;;  %2551 = vrsqrt.f32 %v4095_v8  ;;  %v1470_v59 = vand.u32 2147483648, %v4083_v42 }
 0x1e2   : > { %v2532_v30 = vpop.eup %2531  ;;  %v1452_v45 = vmul.f32 %v2530_v28, %v4040_v27  ;;  %vm1481_vm15 = vcmp.eq.f32.partialorder %v4095_v8, inf  ;;  %v1484_v60 = vand.u32 2147483648, %v4095_v8  ;;  %vm1483_vm0 = vcmp.eq.f32.partialorder %v4095_v8, 0.0 }
 0x1e3   : > { %v1855_v6 = vmul.f32 %v2532_v30, %v4043_v34  ;;  %2553 = vrcp.f32 %v1731_v46  ;;  %v1664_v36 = vmul.f32 1.442695, %v1543_v52 }
 0x1e4   : > { %v2534_v13 = vpop.eup %2533  ;;  %v1454_v40 = vsel %vm1453_vm7, %v4040_v27, %v1452_v45 }
 0x1e5   : > { %v2536_v26 = vpop.eup %2535  ;;  %1919 = vst [vmem:[%s3266_s24 + $0x188] sm:$0xff] %v1855_v6  ;;  %2555 = vpow2.f32 %v1664_v36  ;;  %v1457_v37 = vsel %vm1455_vm8, %v1456_v5, %v1454_v40  ;;  %v1459_v33 = vmul.f32 %v2534_v13, %v4053_v44 }
 0x1e6   : > { %v4111_v29 = vpop.eup %2537  ;;  %v1857_v14 = vmul.f32 %v2536_v26, %v4060_v16  ;;  %v1545_v34 = vsub.f32 0.0, %v1457_v37 }
 0x1e7   : > { %v2540_v1 = vpop.eup %2539  ;;  %v1733_v27 = vadd.f32 1.0, %v4111_v29  ;;  %v1461_v4 = vsel %vm1460_vm9, %v4053_v44, %v1459_v33 }
 0x1e8   : > { %v2542_v31 = vpop.eup %2541  ;;  %1921 = vst [vmem:[%s3266_s24 + $0x198] sm:$0xff] %v1857_v14  ;;  %v1858_v48 = vmul.f32 %v2540_v1, %v4070_v9  ;;  %v1668_v22 = vmul.f32 1.442695, %v1545_v34  ;;  %v1464_v12 = vsel %vm1462_vm10, %v1463_v39, %v1461_v4 }
 0x1e9   : > { %v2544_v23 = vpop.eup %2543  ;;  %2557 = vrcp.f32 %v1733_v27  ;;  %v1734_v61 = vadd.f32 1.0, %v2542_v31  ;;  %v1546_v35 = vsub.f32 0.0, %v1464_v12 }
 0x1ea   : > { %v2546_v18 = vpop.eup %2545  ;;  %1922 = vst [vmem:[%s3266_s24 + $0x1a0] sm:$0xff] %v1858_v48  ;;  %2559 = vpow2.f32 %v1668_v22  ;;  %v1473_v0 = vmul.f32 %v2544_v23, %v4065_v17 }
 0x1eb   : > { %v2548_v16 = vpop.eup %2547  ;;  %2561 = vrcp.f32 %v1734_v61  ;;  %v1736_v44 = vadd.f32 1.0, %v2546_v18  ;;  %v1670_v2 = vmul.f32 1.442695, %v1546_v35 }
 0x1ec   : > { %v1475_v41 = vsel %vm1474_vm11, %v4065_v17, %v1473_v0  ;;  %v1466_v3 = vmul.f32 %v2548_v16, %v4083_v42 }
 0x1ed   : > { %v2550_v47 = vpop.eup %2549  ;;  %2563 = vrcp.f32 %v1736_v44  ;;  %v1478_v21 = vsel %vm1476_vm12, %v1477_v55, %v1475_v41 }
 0x1ee   : > { %v2552_v25 = vpop.eup %2551  ;;  %v1860_v9 = vmul.f32 %v2550_v47, %v4087_v63  ;;  %2565 = vpow2.f32 %v1670_v2  ;;  %v1548_v10 = vsub.f32 0.0, %v1478_v21  ;;  %v1468_v15 = vsel %vm1467_vm13, %v4083_v42, %v1466_v3 }
 0x1ef   : > { %v1471_v17 = vsel %vm1469_vm14, %v1470_v59, %v1468_v15  ;;  %v1480_v56 = vmul.f32 %v2552_v25, %v4095_v8 }
 0x1f0   : > { %v2554_v50 = vpop.eup %2553  ;;  %1924 = vst [vmem:[%s3266_s24 + $0x1b0] sm:$0xff] %v1860_v9  ;;  %v1674_v11 = vmul.f32 1.442695, %v1548_v10  ;;  %v1547_v24 = vsub.f32 0.0, %v1471_v17 }
 0x1f1   : > { %v1859_v62 = vmul.f32 %v2554_v50, %v4099_v19  ;;  %v1482_v51 = vsel %vm1481_vm15, %v4095_v8, %v1480_v56 }
 0x1f2   : > { %v2556_v20 = vpop.eup %2555  ;;  %2567 = vpow2.f32 %v1674_v11  ;;  %v1672_v49 = vmul.f32 1.442695, %v1547_v24  ;;  %v1485_v42 = vsel %vm1483_vm0, %v1484_v60, %v1482_v51 }
 0x1f3   : > { %1923 = vst [vmem:[%s3266_s24 + $0x1a8] sm:$0xff] %v1859_v62  ;;  %v1735_v7 = vadd.f32 1.0, %v2556_v20  ;;  %v1549_v54 = vsub.f32 0.0, %v1485_v42 }
 0x1f4   : > { %2569 = vpow2.f32 %v1672_v49 }
 0x1f5   : > { %2571 = vrcp.f32 %v1735_v7  ;;  %v1676_v32 = vmul.f32 1.442695, %v1549_v54 }
 0x1f6   : > { %v2558_v63 = vpop.eup %2557 }
 0x1f7   : > { %v2560_v57 = vpop.eup %2559  ;;  %v1861_v38 = vmul.f32 %v2558_v63, %v4111_v29  ;;  %2573 = vpow2.f32 %v1676_v32 }
 0x1f8   : > { %v2562_v43 = vpop.eup %2561  ;;  %v1737_v8 = vadd.f32 1.0, %v2560_v57 }
 0x1f9   : > { %1925 = vst [vmem:[%s3266_s24 + $0x1b8] sm:$0xff] %v1861_v38  ;;  %v1862_v53 = vmul.f32 %v2562_v43, %v2542_v31 }
 0x1fa   : > { %v2564_v19 = vpop.eup %2563  ;;  %2575 = vrcp.f32 %v1737_v8 }
 0x1fb   : > { %v2566_v58 = vpop.eup %2565  ;;  %1926 = vst [vmem:[%s3266_s24 + $0x1c0] sm:$0xff] %v1862_v53  ;;  %v1864_v28 = vmul.f32 %v2564_v19, %v2546_v18 }
 0x1fc   : > { %v1738_v46 = vadd.f32 1.0, %v2566_v58 }
 0x1fd   : > { %1928 = vst [vmem:[%s3266_s24 + $0x1d0] sm:$0xff] %v1864_v28 }
 0x1fe   : > { %2577 = vrcp.f32 %v1738_v46 }
 0x1ff   : > { %v2568_v52 = vpop.eup %2567 }
 0x200   : > { %v1740_v30 = vadd.f32 1.0, %v2568_v52 }
 0x201   : > { %v2570_v45 = vpop.eup %2569 }
 0x202   : > { %v2572_v6 = vpop.eup %2571  ;;  %2579 = vrcp.f32 %v1740_v30  ;;  %v1739_v36 = vadd.f32 1.0, %v2570_v45 }
 0x203   : > { %v1863_v5 = vmul.f32 %v2572_v6, %v2556_v20 }
 0x204   : > { %v2574_v13 = vpop.eup %2573  ;;  %2581 = vrcp.f32 %v1739_v36 }
 0x205   : > { %1927 = vst [vmem:[%s3266_s24 + $0x1c8] sm:$0xff] %v1863_v5  ;;  %v1741_v40 = vadd.f32 1.0, %v2574_v13 }
 0x207   : > { %v2576_v26 = vpop.eup %2575  ;;  %2583 = vrcp.f32 %v1741_v40 }
 0x208   : > { %v1865_v37 = vmul.f32 %v2576_v26, %v2560_v57 }
 0x20a   : > { %1929 = vst [vmem:[%s3266_s24 + $0x1d8] sm:$0xff] %v1865_v37 }
 0x20b   : > { %v2578_v33 = vpop.eup %2577 }
 0x20c   : > { %v1866_v29 = vmul.f32 %v2578_v33, %v2566_v58 }
 0x20e   : > { %1930 = vst [vmem:[%s3266_s24 + $0x1e0] sm:$0xff] %v1866_v29 }
 0x20f   : > { %v2580_v14 = vpop.eup %2579 }
 0x210   : > { %v1868_v34 = vmul.f32 %v2580_v14, %v2568_v52 }
 0x211   : > { %v2582_v39 = vpop.eup %2581 }
 0x212   : > { %1932 = vst [vmem:[%s3266_s24 + $0x1f0] sm:$0xff] %v1868_v34  ;;  %v1867_v1 = vmul.f32 %v2582_v39, %v2570_v45 }
 0x214   : > { %v2584_v27 = vpop.eup %2583  ;;  %1931 = vst [vmem:[%s3266_s24 + $0x1e8] sm:$0xff] %v1867_v1 }
 0x215   : > { %v1869_v4 = vmul.f32 %v2584_v27, %v2574_v13 }
 0x217   : > { %1933 = vst [vmem:[%s3266_s24 + $0x1f8] sm:$0xff] %v1869_v4 }
 0x218   : > { %2598 = shalt.err (!%p2595_p5)
}
 0x219   : > { %s2599_s13 = scalar_lea.hbm %s4155_s8, 8192  ;;  %s2603_s14 = scalar_lea.hbm %s4211_s4, 16384 }
 0x21a   : > { %p2600_p6 = scmp.ne.s32.totalorder %s4155_s8, %s2599_s13  ;;  %p2604_p10 = scmp.lt.s32.totalorder %s4155_s8, %s4211_s4 }
 0x21b   : > { %p2605_p11 = scmp.lt.s32.totalorder %s2603_s14, %s2599_s13 }
 0x21c   : > { %p2601_p7 = pnand %p2600_p6, %p2732_p4 }
 0x21d   : > { %p2606_p12 = por %p2605_p11, %p2604_p10 }
 0x21e   : > { %p2602_p9 = pneg %p2601_p7 }
 0x220   : > { %p2607_p13 = pnand %p2606_p12, %p2602_p9 }
 0x222   : > { %2610 = shalt.err (!%p2607_p13)
}
 0x223   : > { %s2665_s24 = smov 512   ;;  %s2666_s26 = smov 32  }
 0x224   : > { %2109 = dma.vmem_to_hbm [thread:$0]  (%p2732_p4), %s4157_s29, 8192, %s4155_s8, %s4162_s9, %s2665_s24, %s2665_s24, %s2666_s26  }
 0x225 PF: > { %p2115_p0 = scmp.ge.s32.totalorder %s2661_s20, 2  ;;  %s1966_s30 = sand.u32 1, %s2641_s15  }
 0x226   : > { %s1967_s6 = scalar_lea.sflag [#allocation3], %s1966_s30 }
 0x227   : > { %p2112_p1 = pnand %p2115_p0, %p2739_p8 }
 0x229   : > { %p2113_p2 = pneg %p2112_p1 }
 0x22b   : > { %2636 = dma.done.wait (%p2113_p2), %s1967_s6, 8192  }
 0x22c   : > { %2638 = vsyncadd (%p2113_p2), %s1967_s6, 4294959104  ;;  %s17_s20 = sadd.s32 1, %s2661_s20   ;;  %s4225_s15 = smov %s2645_s16 }
 0x22d   : > { %p14_p3 = scmp.ge.s32.totalorder %s17_s20, 4   ;;  %s4226_s16 = smov %s2649_s17 }
 0x22e   : > { %s4227_s17 = smov %s2745_s28  ;;  %s4228_s18 = smov %s2657_s19 }
 0x22f   : > { %s4229_s19 = smov %s4231_s23  ;;  %16 = sbr.rel (!%p14_p3) target bundleno = 4 (0x4), region = 78 }
 0x234   :  { %1972 = vsyncpa [#allocation3], 1 }
 0x235   :  { %1974 = vsyncpa [#allocation3 + $0x1], 1 }

</bundles_post_ra>
